<compile_context>
chip_gen: v7x
topology: tpu7x:2x2x1
jax: 0.10.0
libtpu: 0.0.40
codegen_flags: <defaults>
</compile_context>

<pallas_src>
import jax
import jax.numpy as jnp
from jax.experimental import pallas as pl
from jax.experimental.pallas import tpu as pltpu


def _residual_ff_kernel(x_ref, w1_ref, b1_ref, w2_ref, b2_ref, o_ref):
    x = x_ref[...]                                                   # (TM, D) f32
    # MXU is bf16-native on v5e/v6e/v7x: bf16 inputs, f32 accumulation.
    h = jnp.dot(x.astype(jnp.bfloat16), w1_ref[...],                 # (TM, H) f32
                preferred_element_type=jnp.float32)
    h = jax.nn.gelu(h + b1_ref[...])                                 # f32 (EUP tanh)
    y = jnp.dot(h.astype(jnp.bfloat16), w2_ref[...],                 # (TM, D) f32
                preferred_element_type=jnp.float32)
    y = y + b2_ref[...] + x                                          # bias + residual, f32
    o_ref[...] = y.astype(o_ref.dtype)


def _choose_tile_m(M, max_tile=512):
    """Largest row tile (multiple of 8, capped at max_tile) keeping >= 2 grid steps."""
    if M < 16:
        return M
    return max(8, min(max_tile, (M // 2) // 8 * 8))


def residual_feedforward(x, w1, b1, w2, b2, *, tile_m=None):
    """Fused Residual(FeedForward): x:(B,N,D), w1:(D,H), b1:(H,), w2:(H,D), b2:(D,)."""
    B, N, D = x.shape
    H = w1.shape[1]
    assert w1.shape == (D, H) and w2.shape == (H, D)
    assert b1.shape == (H,) and b2.shape == (D,)
    assert D % 128 == 0 and H % 128 == 0, "keep lane axis a multiple of 128"

    M = B * N
    xm = x.reshape(M, D)

    if tile_m is None:
        tile_m = _choose_tile_m(M)
    grid_m = pl.cdiv(M, tile_m)            # no jnp.pad: tail block is masked by Pallas

    w1b = w1.astype(jnp.bfloat16)
    w2b = w2.astype(jnp.bfloat16)
    b1r = b1.reshape(1, H).astype(jnp.float32)
    b2r = b2.reshape(1, D).astype(jnp.float32)

    cost = pl.CostEstimate(
        flops=4 * M * D * H,                       # two matmuls
        transcendentals=M * H,                     # gelu
        bytes_accessed=(M * D * 4                  # x (f32 in)
                        + D * H * 2 + H * D * 2    # W1, W2 (bf16)
                        + H * 4 + D * 4            # biases
                        + M * D * 4),              # out (f32)
    )

    out = pl.pallas_call(
        _residual_ff_kernel,
        out_shape=jax.ShapeDtypeStruct((M, D), x.dtype),
        grid=(grid_m,),
        in_specs=[
            pl.BlockSpec((tile_m, D), lambda i: (i, 0)),   # x tile (pipelined over rows)
            pl.BlockSpec((D, H), lambda i: (0, 0)),        # W1 (VMEM-resident, bf16)
            pl.BlockSpec((1, H), lambda i: (0, 0)),        # b1
            pl.BlockSpec((H, D), lambda i: (0, 0)),        # W2 (VMEM-resident, bf16)
            pl.BlockSpec((1, D), lambda i: (0, 0)),        # b2
        ],
        out_specs=pl.BlockSpec((tile_m, D), lambda i: (i, 0)),
        compiler_params=pltpu.CompilerParams(
            dimension_semantics=("parallel",),             # pipeline + v7x megacore sharding
            vmem_limit_bytes=32 * 1024 * 1024,
        ),
        cost_estimate=cost,
    )(xm, w1b, b1r, w2b, b2r)

    return out.reshape(B, N, D)


def residual_feedforward_ref(x, w1, b1, w2, b2):
    """Pure-JAX reference: Residual(FeedForward).forward(x) = fn(x) + x."""
    h = jax.nn.gelu(x @ w1 + b1)
    return h @ w2 + b2 + x


def init_params(key, dim, hidden):
    k1, k2, k3, k4 = jax.random.split(key, 4)
    return dict(
        w1=jax.random.normal(k1, (dim, hidden), jnp.float32) * 0.05,
        b1=jax.random.normal(k2, (hidden,), jnp.float32) * 0.05,
        w2=jax.random.normal(k3, (hidden, dim), jnp.float32) * 0.05,
        b2=jax.random.normal(k4, (dim,), jnp.float32) * 0.05,
    )


if __name__ == "__main__":
    B, N, D, H = 2, 256, 128, 256          # batch=2, seq=256 tokens, dim=128, mlp hidden=256

    key = jax.random.PRNGKey(0)
    kp, kx = jax.random.split(key)
    p = init_params(kp, D, H)
    x = jax.random.normal(kx, (B, N, D), jnp.float32)

    fwd = jax.jit(lambda x, p: residual_feedforward(x, p["w1"], p["b1"], p["w2"], p["b2"]))
    out = jax.block_until_ready(fwd(x, p))

    ref = residual_feedforward_ref(x, p["w1"], p["b1"], p["w2"], p["b2"])

    assert out.shape == (B, N, D), out.shape
    assert jnp.all(jnp.isfinite(out))
    # bf16 MXU inputs -> slightly looser tolerance than a pure-f32 comparison
    assert jnp.allclose(out, ref, rtol=2e-2, atol=2e-2), float(jnp.max(jnp.abs(out - ref)))
    print("KERNEL_OK")
</pallas_src>

<mosaic_0001>
module attributes {stable_mosaic.version = 11 : i64} {
  func.func @_residual_ff_kernel(%arg0: i32, %arg1: memref<256x128xf32, #tpu.memory_space<vmem>>, %arg2: memref<128x256xbf16, #tpu.memory_space<vmem>>, %arg3: memref<1x256xf32, #tpu.memory_space<vmem>>, %arg4: memref<256x128xbf16, #tpu.memory_space<vmem>>, %arg5: memref<1x128xf32, #tpu.memory_space<vmem>>, %arg6: memref<256x128xf32, #tpu.memory_space<vmem>>) attributes {dimension_semantics = [#tpu.dimension_semantics<parallel>], iteration_bounds = array<i64: 2>, scalar_prefetch = 0 : i64, scratch_operands = 0 : i64, tpu.core_type = #tpu.core_type<tc>, window_params = [{transform_indices = @transform_0, window_bounds = array<i64: 256, 128>}, {pipeline_mode = #tpu.pipeline_mode<synchronous>, transform_indices = @transform_1, window_bounds = array<i64: 128, 256>}, {pipeline_mode = #tpu.pipeline_mode<synchronous>, transform_indices = @transform_2, window_bounds = array<i64: 1, 256>}, {pipeline_mode = #tpu.pipeline_mode<synchronous>, transform_indices = @transform_3, window_bounds = array<i64: 256, 128>}, {pipeline_mode = #tpu.pipeline_mode<synchronous>, transform_indices = @transform_4, window_bounds = array<i64: 1, 128>}, {transform_indices = @transform_5, window_bounds = array<i64: 256, 128>}]} {
    %c0 = arith.constant 0 : index
    %c0_0 = arith.constant 0 : index
    %0 = vector.load %arg1[%c0, %c0_0] : memref<256x128xf32, #tpu.memory_space<vmem>>, vector<256x128xf32>
    %1 = arith.truncf %0 : vector<256x128xf32> to vector<256x128xbf16>
    %c0_1 = arith.constant 0 : index
    %c0_2 = arith.constant 0 : index
    %2 = vector.load %arg2[%c0_1, %c0_2] : memref<128x256xbf16, #tpu.memory_space<vmem>>, vector<128x256xbf16>
    %cst = arith.constant dense<0.000000e+00> : vector<256x256xf32>
    %3 = tpu.matmul %1, %2, %cst {dimension_numbers = #tpu.dot_dimension_numbers<[1], [0], [0], [1], [0, 0, 1, 1], [], []>} : vector<256x128xbf16>, vector<128x256xbf16>, vector<256x256xf32> -> vector<256x256xf32>
    %c0_3 = arith.constant 0 : index
    %c0_4 = arith.constant 0 : index
    %4 = vector.load %arg3[%c0_3, %c0_4] : memref<1x256xf32, #tpu.memory_space<vmem>>, vector<1x256xf32>
    %5 = vector.broadcast %4 : vector<1x256xf32> to vector<256x256xf32>
    %6 = arith.addf %3, %5 : vector<256x256xf32>
    %7 = arith.mulf %6, %6 : vector<256x256xf32>
    %8 = arith.mulf %6, %7 : vector<256x256xf32>
    %cst_5 = arith.constant 4.471500e-02 : f32
    %9 = vector.broadcast %cst_5 : f32 to vector<256x256xf32>
    %10 = arith.mulf %9, %8 : vector<256x256xf32>
    %11 = arith.addf %6, %10 : vector<256x256xf32>
    %cst_6 = arith.constant 0.797884583 : f32
    %12 = vector.broadcast %cst_6 : f32 to vector<256x256xf32>
    %13 = arith.mulf %12, %11 : vector<256x256xf32>
    %14 = math.tanh %13 : vector<256x256xf32>
    %cst_7 = arith.constant 1.000000e+00 : f32
    %15 = vector.broadcast %cst_7 : f32 to vector<256x256xf32>
    %16 = arith.addf %15, %14 : vector<256x256xf32>
    %cst_8 = arith.constant 5.000000e-01 : f32
    %17 = vector.broadcast %cst_8 : f32 to vector<256x256xf32>
    %18 = arith.mulf %17, %16 : vector<256x256xf32>
    %19 = arith.mulf %6, %18 : vector<256x256xf32>
    %20 = arith.truncf %19 : vector<256x256xf32> to vector<256x256xbf16>
    %c0_9 = arith.constant 0 : index
    %c0_10 = arith.constant 0 : index
    %21 = vector.load %arg4[%c0_9, %c0_10] : memref<256x128xbf16, #tpu.memory_space<vmem>>, vector<256x128xbf16>
    %cst_11 = arith.constant dense<0.000000e+00> : vector<256x128xf32>
    %22 = tpu.matmul %20, %21, %cst_11 {dimension_numbers = #tpu.dot_dimension_numbers<[1], [0], [0], [1], [0, 0, 1, 1], [], []>} : vector<256x256xbf16>, vector<256x128xbf16>, vector<256x128xf32> -> vector<256x128xf32>
    %c0_12 = arith.constant 0 : index
    %c0_13 = arith.constant 0 : index
    %23 = vector.load %arg5[%c0_12, %c0_13] : memref<1x128xf32, #tpu.memory_space<vmem>>, vector<1x128xf32>
    %24 = vector.broadcast %23 : vector<1x128xf32> to vector<256x128xf32>
    %25 = arith.addf %22, %24 : vector<256x128xf32>
    %26 = arith.addf %25, %0 : vector<256x128xf32>
    %c0_14 = arith.constant 0 : index
    %c0_15 = arith.constant 0 : index
    %27 = vector.load %arg6[%c0_14, %c0_15] : memref<256x128xf32, #tpu.memory_space<vmem>>, vector<256x128xf32>
    tpu.vector_store %arg6[%c0_14, %c0_15], %26 {strides = array<i32>} : memref<256x128xf32, #tpu.memory_space<vmem>>, vector<256x128xf32>,
    return
  }
  func.func @transform_0(%arg0: i32) -> (i32, i32) {
    %c0_i32 = arith.constant 0 : i32
    %c0_i32_0 = arith.constant 0 : i32
    return %arg0, %c0_i32 : i32, i32
  }
  func.func @transform_1(%arg0: i32) -> (i32, i32) {
    %c0_i32 = arith.constant 0 : i32
    %c0_i32_0 = arith.constant 0 : i32
    %c0_i32_1 = arith.constant 0 : i32
    return %c0_i32, %c0_i32_0 : i32, i32
  }
  func.func @transform_2(%arg0: i32) -> (i32, i32) {
    %c0_i32 = arith.constant 0 : i32
    %c0_i32_0 = arith.constant 0 : i32
    %c0_i32_1 = arith.constant 0 : i32
    return %c0_i32, %c0_i32_0 : i32, i32
  }
  func.func @transform_3(%arg0: i32) -> (i32, i32) {
    %c0_i32 = arith.constant 0 : i32
    %c0_i32_0 = arith.constant 0 : i32
    %c0_i32_1 = arith.constant 0 : i32
    return %c0_i32, %c0_i32_0 : i32, i32
  }
  func.func @transform_4(%arg0: i32) -> (i32, i32) {
    %c0_i32 = arith.constant 0 : i32
    %c0_i32_0 = arith.constant 0 : i32
    %c0_i32_1 = arith.constant 0 : i32
    return %c0_i32, %c0_i32_0 : i32, i32
  }
  func.func @transform_5(%arg0: i32) -> (i32, i32) {
    %c0_i32 = arith.constant 0 : i32
    %c0_i32_0 = arith.constant 0 : i32
    return %arg0, %c0_i32 : i32, i32
  }
}

</mosaic_0001>

<bundles_post_ra>
// kernel: _lambda_.1
= control target key start
LH: loop header
LB: loop body
LE: loop exit
PB: predicated region body
PF: predicated region fallthrough
CT: control target
= control target key end

     0   :  { %10 = vsyncpa [#allocation3], 0  ;;  %s3236_s0 = inlined_call_operand.vmem [shape: f32[512,128], index: 0, kind: input, shape index: {}]   ;;  %s3237_s1 = inlined_call_operand.vmem [shape: bf16[128,256], index: 1, kind: input, shape index: {}]   ;;  %s3238_s2 = inlined_call_operand.vmem [shape: f32[1,256], index: 2, kind: input, shape index: {}]   ;;  %s3239_s3 = inlined_call_operand.vmem [shape: bf16[256,128], index: 3, kind: input, shape index: {}]   ;;  %s3240_s4 = inlined_call_operand.vmem [shape: f32[1,128], index: 4, kind: input, shape index: {}]   ;;  %s3241_s5 = inlined_call_operand.hbm [shape: f32[512,128], index: 5, kind: output, shape index: {}]  }
   0x1   :  { %12 = vsyncpa [#allocation3 + $0x1], 0  ;;  %s2118_s18 = smov 0   ;;  %s2120_s19 = smov 0  }
   0x2   :  { %s2122_s20 = smov 0   ;;  %s2124_s21 = smov 0  }
   0x3 LB: > { %s2139_s22 = sadd.s32 4294967295, %s2082_s21   ;;  %s1620_s23 = sadd.s32 4294967294, %s2082_s21   ;;  %s2082_s21 = sphi %s2124_s21, %s3247_s21   ;;  %s2078_s20 = sphi %s2122_s20, %s3246_s20   ;;  %s2074_s19 = sphi %s2120_s19, %s3245_s19   ;;  %s2070_s18 = sphi %s2118_s18, %s3244_s18  }
   0x4   : > { %s2143_s24 = sadd.s32 1, %s2082_s21   ;;  %s135_s25 = sadd.s32 1, %s2078_s20 }
   0x5   : > { %s132_s26 = ssub.s32 %s2082_s21, %s2143_s24  ;;  %p145_p0 = scmp.ne.s32.totalorder %s2078_s20, %s2074_s19 }
   0x6   : > { %p133_p1 = scmp.eq.s32.totalorder %s132_s26, 0  ;;  %p146_p2 = scmp.eq.s32.totalorder %s2139_s22, 1 }
   0x7   : > { %p151_p3 = scmp.ne.s32.totalorder %s2074_s19, %s2070_s18  ;;  %p152_p4 = scmp.eq.s32.totalorder %s1620_s23, 1 }
   0x8   : > { %s2154_s27 = scalar_select %p133_p1, %s2078_s20, %s135_s25  }
   0x9   : > { %p2156_p5 = por %p146_p2, %p145_p0  ;;  %p2160_p6 = por %p152_p4, %p151_p3 }
   0xa   : > { %p1623_p7 = scmp.ge.s32.totalorder %s2082_s21, 1  ;;  %p191_p8 = scmp.lt.s32.totalorder %s2082_s21, 3 }
   0xc   : > { %p192_p9 = pnand %p1623_p7, %p191_p8 }
   0xd   : > { %v1820_v0 = vld [vmem:[%s3237_s1 + $0x4] ss:$8 sps:$4 sm:$0xff] (!%p192_p9)   ;;  %v1822_v1 = vld [vmem:[%s3237_s1] ss:$8 sps:$4 sm:$0xff] (!%p192_p9)   ;;  %v2084_v2 = vmov (!%p192_p9), 0   ;;  %s1625_s25 = sshll.u32 (!%p192_p9), %s2139_s22, 5 }
   0xe   : > { %195 = sbr.rel (%p192_p9) target bundleno = 688 (0x2b0), region = 40  ;;  %415 = vmatprep.mubr.bf16.mxu0 (!%p192_p9), %v2084_v2  ;;  %383 = vmatprep.subr.bf16.mxu0 (!%p192_p9), %v1820_v0  ;;  %v1823_v3 = vld [vmem:[%s3237_s1 + $0x14] ss:$8 sps:$4 sm:$0xff] (!%p192_p9)   ;;  %v1825_v4 = vld [vmem:[%s3237_s1 + $0x10] ss:$8 sps:$4 sm:$0xff] (!%p192_p9)   ;;  %p220_p10 = scmp.lt.s32.totalorder (!%p192_p9), %s1625_s25, 63 }
   0xf   : > { %384 = vmatpush1.bf16.msra.mxu0 (!%p192_p9), %v1822_v1  ;;  %v1826_v5 = vld [vmem:[%s3237_s1 + $0x24] ss:$8 sps:$4 sm:$0xff] (!%p192_p9)   ;;  %v1828_v6 = vld [vmem:[%s3237_s1 + $0x20] ss:$8 sps:$4 sm:$0xff] (!%p192_p9)   ;;  %v1829_v7 = vld [vmem:[%s3237_s1 + $0x34] ss:$8 sps:$4 sm:$0xff] (!%p192_p9)  }
  0x10   : > { %385 = vmatprep.subr.bf16.mxu0 (!%p192_p9), %v1823_v3  ;;  %v1831_v8 = vld [vmem:[%s3237_s1 + $0x30] ss:$8 sps:$4 sm:$0xff] (!%p192_p9)   ;;  %v1832_v9 = vld [vmem:[%s3237_s1 + $0x44] ss:$8 sps:$4 sm:$0xff] (!%p192_p9)   ;;  %v1834_v10 = vld [vmem:[%s3237_s1 + $0x40] ss:$8 sps:$4 sm:$0xff] (!%p192_p9)  }
  0x11   : > { %v1835_v11 = vld [vmem:[%s3237_s1 + $0x54] ss:$8 sps:$4 sm:$0xff] (!%p192_p9)   ;;  %v1837_v12 = vld [vmem:[%s3237_s1 + $0x50] ss:$8 sps:$4 sm:$0xff] (!%p192_p9)   ;;  %v1838_v13 = vld [vmem:[%s3237_s1 + $0x64] ss:$8 sps:$4 sm:$0xff] (!%p192_p9)  }
  0x12   : > { %v1840_v14 = vld [vmem:[%s3237_s1 + $0x60] ss:$8 sps:$4 sm:$0xff] (!%p192_p9)   ;;  %v1841_v15 = vld [vmem:[%s3237_s1 + $0x74] ss:$8 sps:$4 sm:$0xff] (!%p192_p9)   ;;  %v1843_v16 = vld [vmem:[%s3237_s1 + $0x70] ss:$8 sps:$4 sm:$0xff] (!%p192_p9)  }
  0x13   : > { %386 = vmatpush1.bf16.msra.mxu0 (!%p192_p9), %v1825_v4  ;;  %v1844_v53 = vld [vmem:[%s3239_s3 + $0x40] sm:$0xff] (!%p192_p9)   ;;  %v1846_v57 = vld [vmem:[%s3239_s3 + $0x48] sm:$0xff] (!%p192_p9)   ;;  %v1848_v60 = vld [vmem:[%s3239_s3 + $0x50] sm:$0xff] (!%p192_p9)   ;;  %s1665_s26 = sshll.u32 (!%p192_p9), %s2139_s22, 12  ;;  %s2085_s10 = smov (!%p192_p9), [#allocation2]  }
  0x14   : > { %387 = vmatprep.subr.bf16.mxu0 (!%p192_p9), %v1826_v5  ;;  %v1845_v54 = vld [vmem:[%s3239_s3] sm:$0xff] (!%p192_p9)   ;;  %1666 = vmatprep.subr.bf16.mxu1 (!%p192_p9), %v1844_v53  ;;  %v1847_v58 = vld [vmem:[%s3239_s3 + $0x8] sm:$0xff] (!%p192_p9)   ;;  %v1849_v61 = vld [vmem:[%s3239_s3 + $0x10] sm:$0xff] (!%p192_p9)   ;;  %s2024_s11 = sshll.u32 (!%p192_p9), %s2085_s10, 4  ;;  %s2025_s11 = int_to_ptr.vmem [resolvable:$false] %s2024_s11 }
  0x15   : > { %s3249_s25 = smov (!%p220_p10, %s1625_s25), 63  ;;  %1667 = vmatpush3.bf16.msra.mxu1 %v1845_v54  ;;  %v1850_v0 = vld [vmem:[%s3239_s3 + $0x58] sm:$0xff]   ;;  %v1852_v4 = vld [vmem:[%s3239_s3 + $0x60] sm:$0xff]   ;;  %s2026_s12 = scalar_lea.vmem %s2025_s11, 8192 }
  0x16   : > { %s1626_s14 = sshll.u32 %s3249_s25, 3  ;;  %1668 = vmatprep.subr.bf16.mxu1 %v1846_v57  ;;  %v1851_v1 = vld [vmem:[%s3239_s3 + $0x18] sm:$0xff]   ;;  %v1853_v5 = vld [vmem:[%s3239_s3 + $0x20] sm:$0xff]   ;;  %s3186_s25 = scalar_lea.hbm %s3241_s5, %s1665_s26 }
  0x17   : > { %388 = vmatpush1.bf16.msra.mxu0 %v1828_v6  ;;  %s2216_s8 = scalar_lea.vmem %s3236_s0, %s1626_s14  ;;  %s216_s14 = sand.u32 1, %s2074_s19  }
  0x18   : > { %389 = vmatprep.subr.bf16.mxu0 %v1829_v7  ;;  %v227_v17 = vld [vmem:[%s2216_s8] sm:$0xff]  ;;  %v228_v18 = vld [vmem:[%s2216_s8 + $0x8] sm:$0xff]  ;;  %v229_v20 = vld [vmem:[%s2216_s8 + $0x10] sm:$0xff]  ;;  %s1624_s17 = sshll.u32 %s216_s14, 8  ;;  %s3195_s22 = scalar_lea.sflag [#allocation3], %s216_s14 }
  0x19   : > { %v259_v19 = vpack.c.bf16 %v228_v18, %v227_v17  ;;  %v230_v21 = vld [vmem:[%s2216_s8 + $0x18] sm:$0xff]  ;;  %v231_v23 = vld [vmem:[%s2216_s8 + $0x20] sm:$0xff]  ;;  %v232_v24 = vld [vmem:[%s2216_s8 + $0x28] sm:$0xff]  ;;  %1669 = vmatpush3.bf16.msra.mxu1 %v1847_v58  ;;  %v293_v18 = vlaneseq  ;;  %s3089_s23 = scalar_lea.vmem [#allocation2], %s1624_s17 }
  0x1a   : > { %v260_v22 = vpack.c.bf16 %v230_v21, %v229_v20  ;;  %v261_v25 = vpack.c.bf16 %v232_v24, %v231_v23  ;;  %v233_v26 = vld [vmem:[%s2216_s8 + $0x30] sm:$0xff]  ;;  %v234_v27 = vld [vmem:[%s2216_s8 + $0x38] sm:$0xff]  ;;  %v235_v29 = vld [vmem:[%s2216_s8 + $0x40] sm:$0xff]  ;;  %1670 = vmatprep.subr.bf16.mxu1 %v1848_v60  ;;  %s1558_s30 = sshll.u32 %s3089_s23, 4  ;;  %s3188_s30 = int_to_ptr.vmem [resolvable:$true] %s1558_s30 }
  0x1b   : > { %390 = vmatpush1.bf16.msra.mxu0 %v1831_v8  ;;  %v262_v28 = vpack.c.bf16 %v234_v27, %v233_v26  ;;  %v236_v30 = vld [vmem:[%s2216_s8 + $0x48] sm:$0xff]  ;;  %v237_v32 = vld [vmem:[%s2216_s8 + $0x50] sm:$0xff]  ;;  %v238_v33 = vld [vmem:[%s2216_s8 + $0x58] sm:$0xff]  ;;  %s2020_s9 = scalar_lea.vmem %s3188_s30, 4096  ;;  %p2027_p0 = scmp.lt.s32.totalorder %s3188_s30, %s2025_s11 }
  0x1c   : > { %391 = vmatprep.subr.bf16.mxu0 %v1832_v9  ;;  %v263_v31 = vpack.c.bf16 %v236_v30, %v235_v29  ;;  %v264_v34 = vpack.c.bf16 %v238_v33, %v237_v32  ;;  %v239_v35 = vld [vmem:[%s2216_s8 + $0x60] sm:$0xff]  ;;  %v240_v36 = vld [vmem:[%s2216_s8 + $0x68] sm:$0xff]  ;;  %v241_v38 = vld [vmem:[%s2216_s8 + $0x70] sm:$0xff]  ;;  %p2021_p11 = scmp.ne.s32.totalorder %s3188_s30, %s2020_s9  ;;  %p2028_p1 = scmp.lt.s32.totalorder %s2026_s12, %s2020_s9 }
  0x1d   : > { %v265_v37 = vpack.c.bf16 %v240_v36, %v239_v35  ;;  %v242_v39 = vld [vmem:[%s2216_s8 + $0x78] sm:$0xff]  ;;  %v243_v41 = vld [vmem:[%s2216_s8 + $0x80] sm:$0xff]  ;;  %v244_v42 = vld [vmem:[%s2216_s8 + $0x88] sm:$0xff]  ;;  %1671 = vmatpush3.bf16.msra.mxu1 %v1849_v61 }
  0x1e   : > { %v266_v40 = vpack.c.bf16 %v242_v39, %v241_v38  ;;  %v267_v43 = vpack.c.bf16 %v244_v42, %v243_v41  ;;  %v245_v44 = vld [vmem:[%s2216_s8 + $0x90] sm:$0xff]  ;;  %v246_v45 = vld [vmem:[%s2216_s8 + $0x98] sm:$0xff]  ;;  %v247_v47 = vld [vmem:[%s2216_s8 + $0xa0] sm:$0xff]  ;;  %1672 = vmatprep.subr.bf16.mxu1 %v1850_v0  ;;  %p2022_p12 = pnand %p2021_p11, %p2156_p5  ;;  %p2029_p2 = por %p2028_p1, %p2027_p0 }
  0x1f   : > { %392 = vmatpush1.bf16.msra.mxu0 %v1834_v10  ;;  %v268_v46 = vpack.c.bf16 %v246_v45, %v245_v44  ;;  %v248_v48 = vld [vmem:[%s2216_s8 + $0xa8] sm:$0xff]  ;;  %v249_v50 = vld [vmem:[%s2216_s8 + $0xb0] sm:$0xff]  ;;  %v250_v51 = vld [vmem:[%s2216_s8 + $0xb8] sm:$0xff] }
  0x20   : > { %393 = vmatprep.subr.bf16.mxu0 %v1835_v11  ;;  %v269_v49 = vpack.c.bf16 %v248_v48, %v247_v47  ;;  %v270_v52 = vpack.c.bf16 %v250_v51, %v249_v50  ;;  %v251_v55 = vld [vmem:[%s2216_s8 + $0xc0] sm:$0xff]  ;;  %v252_v56 = vld [vmem:[%s2216_s8 + $0xc8] sm:$0xff]  ;;  %v253_v62 = vld [vmem:[%s2216_s8 + $0xd0] sm:$0xff]  ;;  %p2023_p13 = pneg %p2022_p12 }
  0x21   : > { %v271_v59 = vpack.c.bf16 %v252_v56, %v251_v55  ;;  %v254_v63 = vld [vmem:[%s2216_s8 + $0xd8] sm:$0xff]  ;;  %1673 = vmatpush3.bf16.msra.mxu1 %v1851_v1  ;;  %v255_v6 = vld [vmem:[%s2216_s8 + $0xe0] sm:$0xff]  ;;  %v256_v7 = vld [vmem:[%s2216_s8 + $0xe8] sm:$0xff] }
  0x22   : > { %v272_v3 = vpack.c.bf16 %v254_v63, %v253_v62  ;;  %1674 = vmatprep.subr.bf16.mxu1 %v1852_v4  ;;  %v1854_v8 = vld [vmem:[%s3239_s3 + $0x68] sm:$0xff]   ;;  %v273_v10 = vpack.c.bf16 %v256_v7, %v255_v6  ;;  %v1856_v11 = vld [vmem:[%s3239_s3 + $0x70] sm:$0xff]   ;;  %p2030_p3 = pnand %p2029_p2, %p2023_p13 }
  0x23   : > { %394 = vmatpush1.bf16.msra.mxu0 %v1837_v12  ;;  %v1855_v9 = vld [vmem:[%s3239_s3 + $0x28] sm:$0xff]   ;;  %v1857_v12 = vld [vmem:[%s3239_s3 + $0x30] sm:$0xff]  }
  0x24   : > { %395 = vmatprep.subr.bf16.mxu0 %v1838_v13  ;;  %v257_v13 = vld [vmem:[%s2216_s8 + $0xf0] sm:$0xff] }
  0x25   : > { %1675 = vmatpush3.bf16.msra.mxu1 %v1853_v5 }
  0x26   : > { %1676 = vmatprep.subr.bf16.mxu1 %v1854_v8 }
  0x27   : > { %396 = vmatpush1.bf16.msra.mxu0 %v1840_v14  ;;  %v258_v14 = vld [vmem:[%s2216_s8 + $0xf8] sm:$0xff] }
  0x28   : > { %397 = vmatprep.subr.bf16.mxu0 %v1841_v15  ;;  %v1858_v15 = vld [vmem:[%s3239_s3 + $0x78] sm:$0xff]   ;;  %v274_v17 = vpack.c.bf16 %v258_v14, %v257_v13 }
  0x29   : > { %1677 = vmatpush3.bf16.msra.mxu1 %v1855_v9 }
  0x2a   : > { %1678 = vmatprep.subr.bf16.mxu1 %v1856_v11 }
  0x2b   : > { %398 = vmatpush1.bf16.msra.mxu0 %v1843_v16  ;;  %v1859_v16 = vld [vmem:[%s3239_s3 + $0x38] sm:$0xff]  }
  0x2d   : > { %1679 = vmatpush3.bf16.msra.mxu1 %v1857_v12 }
  0x2e   : > { %416 = vmatmul.mubr.bf16.vlgmr.msra.gmra.mrb[0].mxu0 %v259_v19  ;;  %1680 = vmatprep.subr.bf16.mxu1 %v1858_v15  ;;  %v294_v19 = vshrl.u32 %v293_v18, 7 }
  0x2f   : > { %425 = vmatprep.mubr.bf16.mxu0 %v2084_v2 }
  0x30   : > { %v295_v20 = vsub.s32 0, %v294_v19  ;;  %v299_v21 = vsub.s32 1, %v294_v19 }
  0x31   : > { %1681 = vmatpush3.bf16.msra.mxu1 %v1859_v16 }
  0x36   : > { %426 = vmatmul.mubr.bf16.gmra.mrb[4].mxu0 %v260_v22 }
  0x37   : > { %435 = vmatprep.mubr.bf16.mxu0 %v2084_v2 }
  0x3e   : > { %436 = vmatmul.mubr.bf16.gmra.mrb[8].mxu0 %v261_v25 }
  0x3f   : > { %445 = vmatprep.mubr.bf16.mxu0 %v2084_v2 }
  0x46   : > { %446 = vmatmul.mubr.bf16.gmra.mrb[12].mxu0 %v262_v28 }
  0x47   : > { %455 = vmatprep.mubr.bf16.mxu0 %v2084_v2 }
  0x4e   : > { %456 = vmatmul.mubr.bf16.gmra.mrb[16].mxu0 %v263_v31 }
  0x4f   : > { %465 = vmatprep.mubr.bf16.mxu0 %v2084_v2 }
  0x56   : > { %466 = vmatmul.mubr.bf16.gmra.mrb[20].mxu0 %v264_v34 }
  0x57   : > { %475 = vmatprep.mubr.bf16.mxu0 %v2084_v2 }
  0x5e   : > { %476 = vmatmul.mubr.bf16.gmra.mrb[24].mxu0 %v265_v37 }
  0x5f   : > { %485 = vmatprep.mubr.bf16.mxu0 %v2084_v2 }
  0x66   : > { %486 = vmatmul.mubr.bf16.gmra.mrb[28].mxu0 %v266_v40 }
  0x67   : > { %495 = vmatprep.mubr.bf16.mxu0 %v2084_v2 }
  0x6e   : > { %496 = vmatmul.mubr.bf16.gmra.mrb[32].mxu0 %v267_v43 }
  0x6f   : > { %505 = vmatprep.mubr.bf16.mxu0 %v2084_v2 }
  0x76   : > { %506 = vmatmul.mubr.bf16.gmra.mrb[36].mxu0 %v268_v46 }
  0x77   : > { %515 = vmatprep.mubr.bf16.mxu0 %v2084_v2 }
  0x7e   : > { %516 = vmatmul.mubr.bf16.gmra.mrb[40].mxu0 %v269_v49 }
  0x7f   : > { %525 = vmatprep.mubr.bf16.mxu0 %v2084_v2 }
  0x86   : > { %526 = vmatmul.mubr.bf16.gmra.mrb[44].mxu0 %v270_v52 }
  0x87   : > { %535 = vmatprep.mubr.bf16.mxu0 %v2084_v2 }
  0x8e   : > { %536 = vmatmul.mubr.bf16.gmra.mrb[48].mxu0 %v271_v59 }
  0x8f   : > { %545 = vmatprep.mubr.bf16.mxu0 %v2084_v2 }
  0x96   : > { %546 = vmatmul.mubr.bf16.gmra.mrb[52].mxu0 %v272_v3 }
  0x97   : > { %555 = vmatprep.mubr.bf16.mxu0 %v2084_v2 }
  0x9e   : > { %556 = vmatmul.mubr.bf16.gmra.mrb[56].mxu0 %v273_v10 }
  0x9f   : > { %565 = vmatprep.mubr.bf16.mxu0 %v2084_v2  ;;  %v291_v2 = vld [vmem:[%s3238_s2] sm:$0x3] }
  0xa0   : > { %v2319_v22 = vrot.slane %v291_v2, %v295_v20  ;;  %v2321_v23 = vrot.slane %v291_v2, %v299_v21 }
  0xa6   : > { %566 = vmatmul.mubr.bf16.gmra.mrb[60].mxu0 %v274_v17 }
 0x101   : > { %v417_v24 = vpop.f32.mrb[0].mxu0 }
 0x102   : > { %v2324_v25 = vadd.f32 %v417_v24, %v2319_v22  ;;  %v419_v26 = vpop.f32.mrb[1].mxu0 }
 0x103   : > { %v2327_v27 = vadd.f32 %v419_v26, %v2321_v23  ;;  %v421_v28 = vpop.f32.mrb[2].mxu0 }
 0x104   : > { %v576_v29 = vmul.f32 %v2324_v25, %v2324_v25  ;;  %v2332_v30 = vadd.f32 %v421_v28, %v2319_v22  ;;  %v423_v31 = vpop.f32.mrb[3].mxu0 }
 0x105   : > { %v577_v32 = vmul.f32 %v2327_v27, %v2327_v27  ;;  %v2337_v33 = vadd.f32 %v423_v31, %v2321_v23 }
 0x106   : > { %v640_v34 = vmul.f32 %v576_v29, %v2324_v25  ;;  %v578_v35 = vmul.f32 %v2332_v30, %v2332_v30 }
 0x107   : > { %v641_v36 = vmul.f32 %v577_v32, %v2327_v27  ;;  %v579_v37 = vmul.f32 %v2337_v33, %v2337_v33 }
 0x108   : > { %v704_v38 = vmul.f32 0.044715, %v640_v34  ;;  %v642_v39 = vmul.f32 %v578_v35, %v2332_v30 }
 0x109   : > { %v705_v40 = vmul.f32 0.044715, %v641_v36  ;;  %v643_v41 = vmul.f32 %v579_v37, %v2337_v33  ;;  %v427_v42 = vpop.f32.mrb[4].mxu0 }
 0x10a   : > { %v768_v43 = vadd.f32 %v704_v38, %v2324_v25  ;;  %v706_v44 = vmul.f32 0.044715, %v642_v39  ;;  %v2349_v45 = vadd.f32 %v427_v42, %v2319_v22  ;;  %v429_v46 = vpop.f32.mrb[5].mxu0 }
 0x10b   : > { %v707_v47 = vmul.f32 0.044715, %v643_v41  ;;  %v2352_v48 = vadd.f32 %v429_v46, %v2321_v23  ;;  %v431_v49 = vpop.f32.mrb[6].mxu0  ;;  %v769_v50 = vadd.f32 %v705_v40, %v2327_v27 }
 0x10c   : > { %v832_v51 = vmul.f32 0.7978846, %v768_v43  ;;  %v770_v52 = vadd.f32 %v706_v44, %v2332_v30  ;;  %v580_v53 = vmul.f32 %v2349_v45, %v2349_v45  ;;  %v2359_v54 = vadd.f32 %v431_v49, %v2319_v22  ;;  %v433_v55 = vpop.f32.mrb[7].mxu0 }
 0x10d   : > { %v581_v56 = vmul.f32 %v2352_v48, %v2352_v48  ;;  %v2364_v57 = vadd.f32 %v433_v55, %v2321_v23  ;;  %v771_v58 = vadd.f32 %v707_v47, %v2337_v33  ;;  %v833_v59 = vmul.f32 0.7978846, %v769_v50 }
 0x10e   : > { %1860 = vtanh.f32 %v832_v51  ;;  %v834_v60 = vmul.f32 0.7978846, %v770_v52  ;;  %v644_v61 = vmul.f32 %v580_v53, %v2349_v45  ;;  %v582_v62 = vmul.f32 %v2359_v54, %v2359_v54 }
 0x10f   : > { %v645_v63 = vmul.f32 %v581_v56, %v2352_v48  ;;  %v583_v0 = vmul.f32 %v2364_v57, %v2364_v57  ;;  %v835_v1 = vmul.f32 0.7978846, %v771_v58  ;;  %1862 = vtanh.f32 %v833_v59 }
 0x110   : > { %1864 = vtanh.f32 %v834_v60  ;;  %v708_v3 = vmul.f32 0.044715, %v644_v61  ;;  %v646_v4 = vmul.f32 %v582_v62, %v2359_v54 }
 0x111   : > { %v709_v5 = vmul.f32 0.044715, %v645_v63  ;;  %v647_v6 = vmul.f32 %v583_v0, %v2364_v57  ;;  %v437_v7 = vpop.f32.mrb[8].mxu0  ;;  %1866 = vtanh.f32 %v835_v1 }
 0x112   : > { %v772_v8 = vadd.f32 %v708_v3, %v2349_v45  ;;  %v710_v9 = vmul.f32 0.044715, %v646_v4  ;;  %v2377_v10 = vadd.f32 %v437_v7, %v2319_v22  ;;  %v439_v11 = vpop.f32.mrb[9].mxu0 }
 0x113   : > { %v773_v12 = vadd.f32 %v709_v5, %v2352_v48  ;;  %v711_v13 = vmul.f32 0.044715, %v647_v6  ;;  %v2381_v14 = vadd.f32 %v439_v11, %v2321_v23  ;;  %v441_v15 = vpop.f32.mrb[10].mxu0 }
 0x114   : > { %v836_v16 = vmul.f32 0.7978846, %v772_v8  ;;  %v774_v17 = vadd.f32 %v710_v9, %v2359_v54  ;;  %v584_v18 = vmul.f32 %v2377_v10, %v2377_v10  ;;  %v2387_v19 = vadd.f32 %v441_v15, %v2319_v22  ;;  %v443_v20 = vpop.f32.mrb[11].mxu0 }
 0x115   : > { %v837_v2 = vmul.f32 0.7978846, %v773_v12  ;;  %v775_v21 = vadd.f32 %v711_v13, %v2364_v57  ;;  %v585_v24 = vmul.f32 %v2381_v14, %v2381_v14  ;;  %v2393_v26 = vadd.f32 %v443_v20, %v2321_v23 }
 0x116   : > { %1868 = vtanh.f32 %v836_v16  ;;  %v838_v28 = vmul.f32 0.7978846, %v774_v17  ;;  %v648_v29 = vmul.f32 %v584_v18, %v2377_v10  ;;  %v586_v31 = vmul.f32 %v2387_v19, %v2387_v19 }
 0x117   : > { %1870 = vtanh.f32 %v837_v2  ;;  %v839_v32 = vmul.f32 0.7978846, %v775_v21  ;;  %v649_v34 = vmul.f32 %v585_v24, %v2381_v14  ;;  %v587_v35 = vmul.f32 %v2393_v26, %v2393_v26 }
 0x118   : > { %v1861_v36 = vpop.eup %1860  ;;  %1872 = vtanh.f32 %v838_v28  ;;  %v712_v37 = vmul.f32 0.044715, %v648_v29  ;;  %v650_v38 = vmul.f32 %v586_v31, %v2387_v19 }
 0x119   : > { %v1863_v39 = vpop.eup %1862  ;;  %1874 = vtanh.f32 %v839_v32  ;;  %v713_v40 = vmul.f32 0.044715, %v649_v34  ;;  %v651_v41 = vmul.f32 %v587_v35, %v2393_v26  ;;  %v447_v42 = vpop.f32.mrb[12].mxu0  ;;  %v2403_v43 = vadd.f32 1.0, %v1861_v36 }
 0x11a   : > { %v1865_v44 = vpop.eup %1864  ;;  %v776_v46 = vadd.f32 %v712_v37, %v2377_v10  ;;  %v714_v47 = vmul.f32 0.044715, %v650_v38  ;;  %v2407_v49 = vadd.f32 %v447_v42, %v2319_v22  ;;  %v449_v50 = vpop.f32.mrb[13].mxu0  ;;  %v961_v51 = vadd.f32 1.0, %v1863_v39 }
 0x11b   : > { %v777_v52 = vadd.f32 %v713_v40, %v2381_v14  ;;  %v715_v53 = vmul.f32 0.044715, %v651_v41  ;;  %v2411_v55 = vadd.f32 %v449_v50, %v2321_v23  ;;  %v451_v56 = vpop.f32.mrb[14].mxu0  ;;  %v2413_v58 = vadd.f32 1.0, %v1865_v44  ;;  %v1867_v0 = vpop.eup %1866 }
 0x11c   : > { %v840_v59 = vmul.f32 0.7978846, %v776_v46  ;;  %v778_v60 = vadd.f32 %v714_v47, %v2387_v19  ;;  %v588_v61 = vmul.f32 %v2407_v49, %v2407_v49  ;;  %v2419_v62 = vadd.f32 %v451_v56, %v2319_v22  ;;  %v453_v63 = vpop.f32.mrb[15].mxu0 }
 0x11d   : > { %v841_v1 = vmul.f32 0.7978846, %v777_v52  ;;  %v779_v3 = vadd.f32 %v715_v53, %v2393_v26  ;;  %v589_v4 = vmul.f32 %v2411_v55, %v2411_v55  ;;  %v2425_v5 = vadd.f32 %v453_v63, %v2321_v23 }
 0x11e   : > { %1876 = vtanh.f32 %v840_v59  ;;  %v842_v6 = vmul.f32 0.7978846, %v778_v60  ;;  %v652_v7 = vmul.f32 %v588_v61, %v2407_v49  ;;  %v590_v8 = vmul.f32 %v2419_v62, %v2419_v62 }
 0x11f   : > { %1878 = vtanh.f32 %v841_v1  ;;  %v843_v9 = vmul.f32 0.7978846, %v779_v3  ;;  %v653_v11 = vmul.f32 %v589_v4, %v2411_v55  ;;  %v591_v12 = vmul.f32 %v2425_v5, %v2425_v5 }
 0x120   : > { %v2433_v13 = vpop.eup %1868  ;;  %1880 = vtanh.f32 %v842_v6  ;;  %v716_v15 = vmul.f32 0.044715, %v652_v7  ;;  %v654_v16 = vmul.f32 %v590_v8, %v2419_v62  ;;  %v963_v17 = vadd.f32 1.0, %v1867_v0 }
 0x121   : > { %v2436_v18 = vpop.eup %1870  ;;  %1882 = vtanh.f32 %v843_v9  ;;  %v717_v20 = vmul.f32 0.044715, %v653_v11  ;;  %v655_v2 = vmul.f32 %v591_v12, %v2425_v5  ;;  %v457_v21 = vpop.f32.mrb[16].mxu0  ;;  %v1025_v24 = vmul.f32 0.5, %v961_v51 }
 0x122   : > { %v2439_v28 = vpop.eup %1872  ;;  %v780_v29 = vadd.f32 %v716_v15, %v2407_v49  ;;  %v718_v31 = vmul.f32 0.044715, %v654_v16  ;;  %v2443_v32 = vadd.f32 %v457_v21, %v2319_v22  ;;  %v459_v34 = vpop.f32.mrb[17].mxu0  ;;  %v1027_v35 = vmul.f32 0.5, %v963_v17 }
 0x123   : > { %v2445_v36 = vpop.eup %1874  ;;  %v781_v37 = vadd.f32 %v717_v20, %v2411_v55  ;;  %v719_v38 = vmul.f32 0.044715, %v655_v2  ;;  %v2449_v39 = vadd.f32 %v459_v34, %v2321_v23  ;;  %v461_v40 = vpop.f32.mrb[18].mxu0  ;;  %v1089_v41 = vmul.f32 %v1025_v24, %v2327_v27 }
 0x124   : > { %v844_v42 = vmul.f32 0.7978846, %v780_v29  ;;  %v782_v44 = vadd.f32 %v718_v31, %v2419_v62  ;;  %v592_v46 = vmul.f32 %v2443_v32, %v2443_v32  ;;  %v2456_v47 = vadd.f32 %v461_v40, %v2319_v22  ;;  %v463_v50 = vpop.f32.mrb[19].mxu0 }
 0x125   : > { %v845_v51 = vmul.f32 0.7978846, %v781_v37  ;;  %v783_v52 = vadd.f32 %v719_v38, %v2425_v5  ;;  %v593_v53 = vmul.f32 %v2449_v39, %v2449_v39  ;;  %v2462_v56 = vadd.f32 %v463_v50, %v2321_v23 }
 0x126   : > { %1884 = vtanh.f32 %v844_v42  ;;  %v846_v27 = vmul.f32 0.7978846, %v782_v44  ;;  %v656_v59 = vmul.f32 %v592_v46, %v2443_v32  ;;  %v594_v60 = vmul.f32 %v2456_v47, %v2456_v47 }
 0x127   : > { %1886 = vtanh.f32 %v845_v51  ;;  %v847_v61 = vmul.f32 0.7978846, %v783_v52  ;;  %v657_v63 = vmul.f32 %v593_v53, %v2449_v39  ;;  %v595_v0 = vmul.f32 %v2462_v56, %v2462_v56 }
 0x128   : > { %v2470_v1 = vpop.eup %1876  ;;  %1888 = vtanh.f32 %v846_v27  ;;  %v720_v3 = vmul.f32 0.044715, %v656_v59  ;;  %v658_v4 = vmul.f32 %v594_v60, %v2456_v47  ;;  %v1091_v6 = vmul.f32 %v1027_v35, %v2337_v33 }
 0x129   : > { %v2474_v7 = vpop.eup %1878  ;;  %1890 = vtanh.f32 %v847_v61  ;;  %v721_v8 = vmul.f32 0.044715, %v657_v63  ;;  %v659_v9 = vmul.f32 %v595_v0, %v2462_v56  ;;  %v1024_v11 = vmul.f32 0.5, %v2403_v43  ;;  %v467_v12 = vpop.f32.mrb[20].mxu0 }
 0x12a   : > { %v2478_v15 = vpop.eup %1880  ;;  %v784_v16 = vadd.f32 %v720_v3, %v2443_v32  ;;  %v722_v17 = vmul.f32 0.044715, %v658_v4  ;;  %v1153_v20 = vpack.c.bf16 %v1091_v6, %v1089_v41  ;;  %v1026_v2 = vmul.f32 0.5, %v2413_v58  ;;  %v469_v21 = vpop.f32.mrb[21].mxu0 }
 0x12b   : > { %v2482_v24 = vpop.eup %1882  ;;  %v785_v33 = vadd.f32 %v721_v8, %v2449_v39  ;;  %v723_v29 = vmul.f32 0.044715, %v659_v9  ;;  %v1088_v31 = vmul.f32 %v1024_v11, %v2324_v25  ;;  %v2487_v34 = vadd.f32 %v467_v12, %v2319_v22  ;;  %v471_v43 = vpop.f32.mrb[22].mxu0 }
 0x12c   : > { %v848_v35 = vmul.f32 0.7978846, %v784_v16  ;;  %v786_v37 = vadd.f32 %v722_v17, %v2456_v47  ;;  %1351 = vmatprep.mubr.bf16.mxu1 %v1153_v20  ;;  %v1090_v38 = vmul.f32 %v1026_v2, %v2332_v30  ;;  %v2492_v58 = vadd.f32 %v469_v21, %v2321_v23  ;;  %v473_v40 = vpop.f32.mrb[23].mxu0 }
 0x12d   : > { %v849_v41 = vmul.f32 0.7978846, %v785_v33  ;;  %v787_v42 = vadd.f32 %v723_v29, %v2462_v56  ;;  %v596_v25 = vmul.f32 %v2487_v34, %v2487_v34  ;;  %v2498_v44 = vadd.f32 %v471_v43, %v2319_v22 }
 0x12e   : > { %1892 = vtanh.f32 %v848_v35  ;;  %v850_v46 = vmul.f32 0.7978846, %v786_v37  ;;  %v1152_v50 = vpack.c.bf16 %v1090_v38, %v1088_v31  ;;  %v597_v51 = vmul.f32 %v2492_v58, %v2492_v58 }
 0x12f   : > { %1894 = vtanh.f32 %v849_v41  ;;  %v851_v30 = vmul.f32 0.7978846, %v787_v42  ;;  %v660_v52 = vmul.f32 %v596_v25, %v2487_v34  ;;  %v598_v53 = vmul.f32 %v2498_v44, %v2498_v44 }
 0x130   : > { %v2505_v27 = vpop.eup %1884  ;;  %1896 = vtanh.f32 %v850_v46  ;;  %1352 = vmatmul.mubr.bf16.vlgmr.msra.gmra.mrb[0].mxu1 %v1152_v50  ;;  %v661_v59 = vmul.f32 %v597_v51, %v2492_v58  ;;  %v2509_v60 = vadd.f32 %v473_v40, %v2321_v23  ;;  %v965_v61 = vadd.f32 1.0, %v2436_v18 }
 0x131   : > { %v2512_v63 = vpop.eup %1886  ;;  %1898 = vtanh.f32 %v851_v30  ;;  %v724_v0 = vmul.f32 0.044715, %v660_v52  ;;  %v662_v3 = vmul.f32 %v598_v53, %v2498_v44  ;;  %v967_v4 = vadd.f32 1.0, %v2445_v36  ;;  %v477_v6 = vpop.f32.mrb[24].mxu0 }
 0x132   : > { %v2516_v8 = vpop.eup %1888  ;;  %v725_v9 = vmul.f32 0.044715, %v661_v59  ;;  %v599_v11 = vmul.f32 %v2509_v60, %v2509_v60  ;;  %v1029_v12 = vmul.f32 0.5, %v965_v61  ;;  %v964_v16 = vadd.f32 1.0, %v2433_v13  ;;  %v479_v17 = vpop.f32.mrb[25].mxu0 }
 0x133   : > { %v2521_v18 = vpop.eup %1890  ;;  %v788_v20 = vadd.f32 %v724_v0, %v2487_v34  ;;  %v726_v2 = vmul.f32 0.044715, %v662_v3  ;;  %v1031_v21 = vmul.f32 0.5, %v967_v4  ;;  %v966_v33 = vadd.f32 1.0, %v2439_v28  ;;  %v481_v36 = vpop.f32.mrb[26].mxu0 }
 0x134   : > { %v789_v29 = vadd.f32 %v725_v9, %v2492_v58  ;;  %v663_v31 = vmul.f32 %v599_v11, %v2509_v60  ;;  %v1093_v43 = vmul.f32 %v1029_v12, %v2352_v48  ;;  %v1028_v35 = vmul.f32 0.5, %v964_v16  ;;  %v483_v37 = vpop.f32.mrb[27].mxu0 }
 0x135   : > { %v852_v38 = vmul.f32 0.7978846, %v788_v20  ;;  %v790_v13 = vadd.f32 %v726_v2, %v2498_v44  ;;  %v1095_v40 = vmul.f32 %v1031_v21, %v2364_v57  ;;  %v1030_v41 = vmul.f32 0.5, %v966_v33 }
 0x136   : > { %v853_v42 = vmul.f32 0.7978846, %v789_v29  ;;  %v727_v25 = vmul.f32 0.044715, %v663_v31  ;;  %v1092_v46 = vmul.f32 %v1028_v35, %v2349_v45  ;;  %v2532_v28 = vadd.f32 %v477_v6, %v2319_v22 }
 0x137   : > { %1900 = vtanh.f32 %v852_v38  ;;  %v854_v50 = vmul.f32 0.7978846, %v790_v13  ;;  %v1155_v51 = vpack.c.bf16 %v1095_v40, %v1093_v43  ;;  %v1094_v48 = vmul.f32 %v1030_v41, %v2359_v54 }
 0x138   : > { %v2535_v30 = vpop.eup %1892  ;;  %1902 = vtanh.f32 %v853_v42  ;;  %v791_v52 = vadd.f32 %v727_v25, %v2509_v60  ;;  %v600_v57 = vmul.f32 %v2532_v28, %v2532_v28  ;;  %v2541_v53 = vadd.f32 %v479_v17, %v2321_v23 }
 0x139   : > { %v2543_v45 = vpop.eup %1894  ;;  %1904 = vtanh.f32 %v854_v50  ;;  %1359 = vmatprep.mubr.bf16.mxu1 %v1155_v51  ;;  %v1154_v59 = vpack.c.bf16 %v1094_v48, %v1092_v46  ;;  %v2546_v61 = vadd.f32 %v481_v36, %v2319_v22  ;;  %v2549_v54 = vadd.f32 %v483_v37, %v2321_v23  ;;  %v487_v0 = vpop.f32.mrb[28].mxu0 }
 0x13a   : > { %v2551_v3 = vpop.eup %1896  ;;  %v855_v4 = vmul.f32 0.7978846, %v791_v52  ;;  %v664_v6 = vmul.f32 %v600_v57, %v2532_v28  ;;  %v601_v9 = vmul.f32 %v2541_v53, %v2541_v53  ;;  %v969_v11 = vadd.f32 1.0, %v2474_v7  ;;  %v489_v12 = vpop.f32.mrb[29].mxu0 }
 0x13b   : > { %v2557_v16 = vpop.eup %1898  ;;  %1360 = vmatmul.mubr.bf16.gmra.mrb[4].mxu1 %v1154_v59  ;;  %v602_v17 = vmul.f32 %v2546_v61, %v2546_v61  ;;  %v603_v20 = vmul.f32 %v2549_v54, %v2549_v54  ;;  %v971_v2 = vadd.f32 1.0, %v2482_v24  ;;  %v968_v21 = vadd.f32 1.0, %v2470_v1  ;;  %v491_v33 = vpop.f32.mrb[30].mxu0 }
 0x13c   : > { %1906 = vtanh.f32 %v855_v4  ;;  %v728_v36 = vmul.f32 0.044715, %v664_v6  ;;  %v665_v29 = vmul.f32 %v601_v9, %v2541_v53  ;;  %v1033_v7 = vmul.f32 0.5, %v969_v11  ;;  %v493_v31 = vpop.f32.mrb[31].mxu0 }
 0x13d   : > { %v666_v43 = vmul.f32 %v602_v17, %v2546_v61  ;;  %v667_v35 = vmul.f32 %v603_v20, %v2549_v54  ;;  %v1035_v37 = vmul.f32 0.5, %v971_v2  ;;  %v970_v38 = vadd.f32 1.0, %v2478_v15 }
 0x13e   : > { %v792_v13 = vadd.f32 %v728_v36, %v2532_v28  ;;  %v729_v40 = vmul.f32 0.044715, %v665_v29  ;;  %v1097_v24 = vmul.f32 %v1033_v7, %v2381_v14  ;;  %v1032_v1 = vmul.f32 0.5, %v968_v21 }
 0x13f   : > { %v730_v41 = vmul.f32 0.044715, %v666_v43  ;;  %v731_v42 = vmul.f32 0.044715, %v667_v35  ;;  %v1099_v25 = vmul.f32 %v1035_v37, %v2393_v26  ;;  %v1034_v46 = vmul.f32 0.5, %v970_v38 }
 0x140   : > { %v856_v50 = vmul.f32 0.7978846, %v792_v13  ;;  %v793_v51 = vadd.f32 %v729_v40, %v2541_v53  ;;  %v1096_v48 = vmul.f32 %v1032_v1, %v2377_v10  ;;  %v2575_v52 = vadd.f32 %v487_v0, %v2319_v22 }
 0x141   : > { %v2577_v15 = vpop.eup %1900  ;;  %v794_v57 = vadd.f32 %v730_v41, %v2546_v61  ;;  %v795_v14 = vadd.f32 %v731_v42, %v2549_v54  ;;  %v1157_v59 = vpack.c.bf16 %v1099_v25, %v1097_v24  ;;  %v1098_v4 = vmul.f32 %v1034_v46, %v2387_v19  ;;  %v497_v6 = vpop.f32.mrb[32].mxu0 }
 0x142   : > { %v2582_v26 = vpop.eup %1902  ;;  %1908 = vtanh.f32 %v856_v50  ;;  %v857_v9 = vmul.f32 0.7978846, %v793_v51  ;;  %v604_v10 = vmul.f32 %v2575_v52, %v2575_v52  ;;  %v2587_v0 = vadd.f32 %v489_v12, %v2321_v23  ;;  %v499_v11 = vpop.f32.mrb[33].mxu0 }
 0x143   : > { %v2589_v17 = vpop.eup %1904  ;;  %v858_v20 = vmul.f32 0.7978846, %v794_v57  ;;  %v859_v2 = vmul.f32 0.7978846, %v795_v14  ;;  %1367 = vmatprep.mubr.bf16.mxu1 %v1157_v59  ;;  %v1156_v21 = vpack.c.bf16 %v1098_v4, %v1096_v48  ;;  %v2592_v19 = vadd.f32 %v491_v33, %v2319_v22  ;;  %v501_v36 = vpop.f32.mrb[34].mxu0 }
 0x144   : > { %1910 = vtanh.f32 %v857_v9  ;;  %v668_v29 = vmul.f32 %v604_v10, %v2575_v52  ;;  %v605_v7 = vmul.f32 %v2587_v0, %v2587_v0  ;;  %v2598_v12 = vadd.f32 %v493_v31, %v2321_v23  ;;  %v503_v43 = vpop.f32.mrb[35].mxu0 }
 0x145   : > { %1912 = vtanh.f32 %v858_v20  ;;  %1368 = vmatmul.mubr.bf16.gmra.mrb[8].mxu1 %v1156_v21  ;;  %v606_v35 = vmul.f32 %v2592_v19, %v2592_v19  ;;  %v973_v37 = vadd.f32 1.0, %v2512_v63  ;;  %v975_v33 = vadd.f32 1.0, %v2521_v18 }
 0x146   : > { %v2604_v38 = vpop.eup %1906  ;;  %1914 = vtanh.f32 %v859_v2  ;;  %v732_v13 = vmul.f32 0.044715, %v668_v29  ;;  %v669_v40 = vmul.f32 %v605_v7, %v2587_v0  ;;  %v607_v31 = vmul.f32 %v2598_v12, %v2598_v12 }
 0x147   : > { %v670_v24 = vmul.f32 %v606_v35, %v2592_v19  ;;  %v1037_v1 = vmul.f32 0.5, %v973_v37  ;;  %v1039_v41 = vmul.f32 0.5, %v975_v33  ;;  %v972_v42 = vadd.f32 1.0, %v2505_v27 }
 0x148   : > { %v796_v25 = vadd.f32 %v732_v13, %v2575_v52  ;;  %v733_v63 = vmul.f32 0.044715, %v669_v40  ;;  %v671_v18 = vmul.f32 %v607_v31, %v2598_v12  ;;  %v974_v46 = vadd.f32 1.0, %v2516_v8 }
 0x149   : > { %v734_v50 = vmul.f32 0.044715, %v670_v24  ;;  %v1101_v51 = vmul.f32 %v1037_v1, %v2411_v55  ;;  %v1103_v48 = vmul.f32 %v1039_v41, %v2425_v5  ;;  %v1036_v57 = vmul.f32 0.5, %v972_v42  ;;  %v2616_v14 = vpop.f32.mrb[36].mxu0 }
 0x14a   : > { %v860_v59 = vmul.f32 0.7978846, %v796_v25  ;;  %v797_v4 = vadd.f32 %v733_v63, %v2587_v0  ;;  %v735_v9 = vmul.f32 0.044715, %v671_v18  ;;  %v1038_v27 = vmul.f32 0.5, %v974_v46  ;;  %v2619_v10 = vpop.f32.mrb[37].mxu0 }
 0x14b   : > { %v798_v20 = vadd.f32 %v734_v50, %v2592_v19  ;;  %v1159_v2 = vpack.c.bf16 %v1103_v48, %v1101_v51  ;;  %v1100_v8 = vmul.f32 %v1036_v57, %v2407_v49  ;;  %v2624_v21 = vadd.f32 %v497_v6, %v2319_v22  ;;  %v2626_v55 = vpop.f32.mrb[38].mxu0 }
 0x14c   : > { %v2628_v5 = vpop.eup %1908  ;;  %1916 = vtanh.f32 %v860_v59  ;;  %v861_v29 = vmul.f32 0.7978846, %v797_v4  ;;  %v799_v7 = vadd.f32 %v735_v9, %v2598_v12  ;;  %v1102_v35 = vmul.f32 %v1038_v27, %v2419_v62  ;;  %v2632_v37 = vpop.f32.mrb[39].mxu0 }
 0x14d   : > { %v862_v33 = vmul.f32 0.7978846, %v798_v20  ;;  %1375 = vmatprep.mubr.bf16.mxu1 %v1159_v2  ;;  %v608_v49 = vmul.f32 %v2624_v21, %v2624_v21  ;;  %v2637_v6 = vadd.f32 %v499_v11, %v2321_v23  ;;  %v2640_v13 = vadd.f32 %v501_v36, %v2319_v22 }
 0x14e   : > { %v2642_v40 = vpop.eup %1910  ;;  %1918 = vtanh.f32 %v861_v29  ;;  %v863_v31 = vmul.f32 0.7978846, %v799_v7  ;;  %v1158_v24 = vpack.c.bf16 %v1102_v35, %v1100_v8  ;;  %v2645_v62 = vadd.f32 %v503_v43, %v2321_v23 }
 0x14f   : > { %v2647_v1 = vpop.eup %1912  ;;  %1920 = vtanh.f32 %v862_v33  ;;  %v672_v41 = vmul.f32 %v608_v49, %v2624_v21  ;;  %v609_v11 = vmul.f32 %v2637_v6, %v2637_v6  ;;  %v610_v36 = vmul.f32 %v2640_v13, %v2640_v13 }
 0x150   : > { %v2654_v42 = vpop.eup %1914  ;;  %1922 = vtanh.f32 %v863_v31  ;;  %1376 = vmatmul.mubr.bf16.gmra.mrb[12].mxu1 %v1158_v24  ;;  %v611_v25 = vmul.f32 %v2645_v62, %v2645_v62  ;;  %v977_v43 = vadd.f32 1.0, %v2543_v45  ;;  %v979_v63 = vadd.f32 1.0, %v2557_v16 }
 0x151   : > { %v736_v18 = vmul.f32 0.044715, %v672_v41  ;;  %v673_v46 = vmul.f32 %v609_v11, %v2637_v6  ;;  %v674_v50 = vmul.f32 %v610_v36, %v2640_v13  ;;  %v976_v51 = vadd.f32 1.0, %v2535_v30  ;;  %v2663_v48 = vpop.f32.mrb[40].mxu0 }
 0x152   : > { %v675_v57 = vmul.f32 %v611_v25, %v2645_v62  ;;  %v1041_v59 = vmul.f32 0.5, %v977_v43  ;;  %v1043_v4 = vmul.f32 0.5, %v979_v63  ;;  %v978_v9 = vadd.f32 1.0, %v2551_v3  ;;  %v2667_v27 = vpop.f32.mrb[41].mxu0 }
 0x153   : > { %v800_v45 = vadd.f32 %v736_v18, %v2624_v21  ;;  %v737_v16 = vmul.f32 0.044715, %v673_v46  ;;  %v738_v20 = vmul.f32 0.044715, %v674_v50  ;;  %v1040_v2 = vmul.f32 0.5, %v976_v51  ;;  %v2670_v8 = vpop.f32.mrb[42].mxu0 }
 0x154   : > { %v739_v29 = vmul.f32 0.044715, %v675_v57  ;;  %v1105_v30 = vmul.f32 %v1041_v59, %v2449_v39  ;;  %v1107_v7 = vmul.f32 %v1043_v4, %v2462_v56  ;;  %v1042_v35 = vmul.f32 0.5, %v978_v9  ;;  %v2674_v33 = vpop.f32.mrb[43].mxu0 }
 0x155   : > { %v864_v49 = vmul.f32 0.7978846, %v800_v45  ;;  %v801_v3 = vadd.f32 %v737_v16, %v2637_v6  ;;  %v802_v31 = vadd.f32 %v738_v20, %v2640_v13  ;;  %v1104_v24 = vmul.f32 %v1040_v2, %v2443_v32 }
 0x156   : > { %v2679_v41 = vpop.eup %1916  ;;  %v803_v11 = vadd.f32 %v739_v29, %v2645_v62  ;;  %v1161_v36 = vpack.c.bf16 %v1107_v7, %v1105_v30  ;;  %v1106_v25 = vmul.f32 %v1042_v35, %v2456_v47  ;;  %v2685_v39 = vadd.f32 %v2616_v14, %v2319_v22 }
 0x157   : > { %1924 = vtanh.f32 %v864_v49  ;;  %v865_v56 = vmul.f32 0.7978846, %v801_v3  ;;  %v866_v43 = vmul.f32 0.7978846, %v802_v31  ;;  %v2689_v63 = vadd.f32 %v2619_v10, %v2321_v23 }
 0x158   : > { %v2691_v18 = vpop.eup %1918  ;;  %v867_v32 = vmul.f32 0.7978846, %v803_v11  ;;  %1383 = vmatprep.mubr.bf16.mxu1 %v1161_v36  ;;  %v1160_v46 = vpack.c.bf16 %v1106_v25, %v1104_v24  ;;  %v612_v50 = vmul.f32 %v2685_v39, %v2685_v39  ;;  %v2697_v47 = vadd.f32 %v2626_v55, %v2319_v22 }
 0x159   : > { %v2699_v14 = vpop.eup %1920  ;;  %1926 = vtanh.f32 %v865_v56  ;;  %v613_v51 = vmul.f32 %v2689_v63, %v2689_v63  ;;  %v2705_v10 = vadd.f32 %v2632_v37, %v2321_v23  ;;  %v981_v57 = vadd.f32 1.0, %v2582_v26  ;;  %v2708_v59 = vpop.f32.mrb[44].mxu0 }
 0x15a   : > { %v2710_v4 = vpop.eup %1922  ;;  %1928 = vtanh.f32 %v866_v43  ;;  %1384 = vmatmul.mubr.bf16.gmra.mrb[16].mxu1 %v1160_v46  ;;  %v676_v55 = vmul.f32 %v612_v50, %v2685_v39  ;;  %v614_v9 = vmul.f32 %v2697_v47, %v2697_v47  ;;  %v983_v45 = vadd.f32 1.0, %v2604_v38  ;;  %v2716_v16 = vpop.f32.mrb[45].mxu0 }
 0x15b   : > { %1930 = vtanh.f32 %v867_v32  ;;  %v677_v37 = vmul.f32 %v613_v51, %v2689_v63  ;;  %v615_v26 = vmul.f32 %v2705_v10, %v2705_v10  ;;  %v1045_v20 = vmul.f32 0.5, %v981_v57  ;;  %v2721_v2 = vpop.f32.mrb[46].mxu0 }
 0x15c   : > { %v740_v29 = vmul.f32 0.044715, %v676_v55  ;;  %v678_v30 = vmul.f32 %v614_v9, %v2697_v47  ;;  %v1047_v7 = vmul.f32 0.5, %v983_v45  ;;  %v980_v35 = vadd.f32 1.0, %v2577_v15  ;;  %v2725_v49 = vpop.f32.mrb[47].mxu0 }
 0x15d   : > { %v741_v38 = vmul.f32 0.044715, %v677_v37  ;;  %v679_v3 = vmul.f32 %v615_v26, %v2705_v10  ;;  %v1109_v31 = vmul.f32 %v1045_v20, %v2492_v58  ;;  %v982_v24 = vadd.f32 1.0, %v2589_v17 }
 0x15e   : > { %v804_v11 = vadd.f32 %v740_v29, %v2685_v39  ;;  %v742_v36 = vmul.f32 0.044715, %v678_v30  ;;  %v1111_v25 = vmul.f32 %v1047_v7, %v2509_v60  ;;  %v1044_v56 = vmul.f32 0.5, %v980_v35 }
 0x15f   : > { %v805_v43 = vadd.f32 %v741_v38, %v2689_v63  ;;  %v743_v32 = vmul.f32 0.044715, %v679_v3  ;;  %v1046_v46 = vmul.f32 0.5, %v982_v24  ;;  %v2735_v15 = vadd.f32 %v2663_v48, %v2319_v22 }
 0x160   : > { %v868_v50 = vmul.f32 0.7978846, %v804_v11  ;;  %v806_v51 = vadd.f32 %v742_v36, %v2697_v47  ;;  %v1163_v58 = vpack.c.bf16 %v1111_v25, %v1109_v31  ;;  %v1108_v17 = vmul.f32 %v1044_v56, %v2487_v34 }
 0x161   : > { %v2739_v57 = vpop.eup %1924  ;;  %v869_v55 = vmul.f32 0.7978846, %v805_v43  ;;  %v807_v60 = vadd.f32 %v743_v32, %v2705_v10  ;;  %v1110_v9 = vmul.f32 %v1046_v46, %v2498_v44  ;;  %v616_v45 = vmul.f32 %v2735_v15, %v2735_v15  ;;  %v2745_v37 = vpop.f32.mrb[48].mxu0 }
 0x162   : > { %1932 = vtanh.f32 %v868_v50  ;;  %v870_v48 = vmul.f32 0.7978846, %v806_v51  ;;  %1391 = vmatprep.mubr.bf16.mxu1 %v1163_v58  ;;  %v2749_v26 = vadd.f32 %v2667_v27, %v2321_v23  ;;  %v2753_v34 = vadd.f32 %v2670_v8, %v2319_v22  ;;  %v2755_v20 = vpop.f32.mrb[49].mxu0 }
 0x163   : > { %v2757_v29 = vpop.eup %1926  ;;  %1934 = vtanh.f32 %v869_v55  ;;  %v871_v44 = vmul.f32 0.7978846, %v807_v60  ;;  %v1162_v30 = vpack.c.bf16 %v1110_v9, %v1108_v17  ;;  %v680_v7 = vmul.f32 %v616_v45, %v2735_v15  ;;  %v2760_v35 = vpop.f32.mrb[50].mxu0 }
 0x164   : > { %v2762_v38 = vpop.eup %1928  ;;  %1936 = vtanh.f32 %v870_v48  ;;  %v617_v27 = vmul.f32 %v2749_v26, %v2749_v26  ;;  %v618_v8 = vmul.f32 %v2753_v34, %v2753_v34  ;;  %v2770_v3 = vadd.f32 %v2674_v33, %v2321_v23  ;;  %v2772_v31 = vpop.f32.mrb[51].mxu0 }
 0x165   : > { %v2774_v24 = vpop.eup %1930  ;;  %1938 = vtanh.f32 %v871_v44  ;;  %1392 = vmatmul.mubr.bf16.gmra.mrb[20].mxu1 %v1162_v30  ;;  %v744_v11 = vmul.f32 0.044715, %v680_v7  ;;  %v985_v36 = vadd.f32 1.0, %v2642_v40  ;;  %v987_v25 = vadd.f32 1.0, %v2654_v42 }
 0x166   : > { %v681_v56 = vmul.f32 %v617_v27, %v2749_v26  ;;  %v682_v43 = vmul.f32 %v618_v8, %v2753_v34  ;;  %v619_v32 = vmul.f32 %v2770_v3, %v2770_v3  ;;  %v984_v33 = vadd.f32 1.0, %v2628_v5 }
 0x167   : > { %v808_v46 = vadd.f32 %v744_v11, %v2735_v15  ;;  %v1049_v50 = vmul.f32 0.5, %v985_v36  ;;  %v1051_v51 = vmul.f32 0.5, %v987_v25  ;;  %v986_v58 = vadd.f32 1.0, %v2647_v1 }
 0x168   : > { %v745_v17 = vmul.f32 0.044715, %v681_v56  ;;  %v746_v55 = vmul.f32 0.044715, %v682_v43  ;;  %v683_v40 = vmul.f32 %v619_v32, %v2770_v3  ;;  %v1048_v42 = vmul.f32 0.5, %v984_v33 }
 0x169   : > { %v872_v60 = vmul.f32 0.7978846, %v808_v46  ;;  %v1113_v9 = vmul.f32 %v1049_v50, %v2541_v53  ;;  %v1115_v45 = vmul.f32 %v1051_v51, %v2549_v54  ;;  %v1050_v48 = vmul.f32 0.5, %v986_v58  ;;  %v2788_v44 = vpop.f32.mrb[52].mxu0 }
 0x16a   : > { %v809_v5 = vadd.f32 %v745_v17, %v2749_v26  ;;  %v810_v30 = vadd.f32 %v746_v55, %v2753_v34  ;;  %v747_v7 = vmul.f32 0.044715, %v683_v40  ;;  %v1112_v1 = vmul.f32 %v1048_v42, %v2532_v28  ;;  %v2793_v27 = vpop.f32.mrb[53].mxu0 }
 0x16b   : > { %1940 = vtanh.f32 %v872_v60  ;;  %v1165_v8 = vpack.c.bf16 %v1115_v45, %v1113_v9  ;;  %v1114_v11 = vmul.f32 %v1050_v48, %v2546_v61  ;;  %v2798_v53 = vadd.f32 %v2708_v59, %v2319_v22  ;;  %v2800_v54 = vpop.f32.mrb[54].mxu0 }
 0x16c   : > { %v2802_v36 = vpop.eup %1932  ;;  %v873_v25 = vmul.f32 0.7978846, %v809_v5  ;;  %v874_v56 = vmul.f32 0.7978846, %v810_v30  ;;  %v811_v43 = vadd.f32 %v747_v7, %v2770_v3  ;;  %v2807_v28 = vadd.f32 %v2716_v16, %v2321_v23  ;;  %v2809_v32 = vpop.f32.mrb[55].mxu0 }
 0x16d   : > { %v2811_v33 = vpop.eup %1934  ;;  %1399 = vmatprep.mubr.bf16.mxu1 %v1165_v8  ;;  %v1164_v61 = vpack.c.bf16 %v1114_v11, %v1112_v1  ;;  %v620_v59 = vmul.f32 %v2798_v53, %v2798_v53  ;;  %v2817_v46 = vadd.f32 %v2721_v2, %v2319_v22  ;;  %v2821_v50 = vadd.f32 %v2725_v49, %v2321_v23 }
 0x16e   : > { %v2823_v51 = vpop.eup %1936  ;;  %1942 = vtanh.f32 %v873_v25  ;;  %v875_v16 = vmul.f32 0.7978846, %v811_v43  ;;  %v621_v58 = vmul.f32 %v2807_v28, %v2807_v28  ;;  %v989_v17 = vadd.f32 1.0, %v2691_v18 }
 0x16f   : > { %v2828_v55 = vpop.eup %1938  ;;  %1944 = vtanh.f32 %v874_v56  ;;  %1400 = vmatmul.mubr.bf16.gmra.mrb[24].mxu1 %v1164_v61  ;;  %v684_v2 = vmul.f32 %v620_v59, %v2798_v53  ;;  %v622_v40 = vmul.f32 %v2817_v46, %v2817_v46  ;;  %v623_v49 = vmul.f32 %v2821_v50, %v2821_v50 }
 0x170   : > { %1946 = vtanh.f32 %v875_v16  ;;  %v685_v42 = vmul.f32 %v621_v58, %v2807_v28  ;;  %v991_v60 = vadd.f32 1.0, %v2710_v4  ;;  %v1053_v9 = vmul.f32 0.5, %v989_v17 }
 0x171   : > { %v748_v45 = vmul.f32 0.044715, %v684_v2  ;;  %v686_v18 = vmul.f32 %v622_v40, %v2817_v46  ;;  %v687_v48 = vmul.f32 %v623_v49, %v2821_v50  ;;  %v988_v5 = vadd.f32 1.0, %v2679_v41  ;;  %v2840_v30 = vpop.f32.mrb[56].mxu0 }
 0x172   : > { %v749_v7 = vmul.f32 0.044715, %v685_v42  ;;  %v1055_v1 = vmul.f32 0.5, %v991_v60  ;;  %v1117_v8 = vmul.f32 %v1053_v9, %v2587_v0  ;;  %v990_v11 = vadd.f32 1.0, %v2699_v14  ;;  %v2844_v25 = vpop.f32.mrb[57].mxu0 }
 0x173   : > { %v812_v4 = vadd.f32 %v748_v45, %v2798_v53  ;;  %v750_v56 = vmul.f32 0.044715, %v686_v18  ;;  %v751_v43 = vmul.f32 0.044715, %v687_v48  ;;  %v1052_v61 = vmul.f32 0.5, %v988_v5  ;;  %v2847_v59 = vpop.f32.mrb[58].mxu0 }
 0x174   : > { %v813_v16 = vadd.f32 %v749_v7, %v2807_v28  ;;  %v1119_v41 = vmul.f32 %v1055_v1, %v2598_v12  ;;  %v1054_v58 = vmul.f32 0.5, %v990_v11  ;;  %v2853_v17 = vadd.f32 %v2745_v37, %v2319_v22  ;;  %v2855_v0 = vpop.f32.mrb[59].mxu0 }
 0x175   : > { %v2857_v14 = vpop.eup %1940  ;;  %v876_v2 = vmul.f32 0.7978846, %v812_v4  ;;  %v814_v40 = vadd.f32 %v750_v56, %v2817_v46  ;;  %v815_v49 = vadd.f32 %v751_v43, %v2821_v50  ;;  %v1116_v42 = vmul.f32 %v1052_v61, %v2575_v52 }
 0x176   : > { %v877_v60 = vmul.f32 0.7978846, %v813_v16  ;;  %v1167_v9 = vpack.c.bf16 %v1119_v41, %v1117_v8  ;;  %v1118_v12 = vmul.f32 %v1054_v58, %v2592_v19  ;;  %v624_v45 = vmul.f32 %v2853_v17, %v2853_v17 }
 0x177   : > { %1948 = vtanh.f32 %v876_v2  ;;  %v878_v37 = vmul.f32 0.7978846, %v814_v40  ;;  %v879_v18 = vmul.f32 0.7978846, %v815_v49  ;;  %v2867_v48 = vadd.f32 %v2755_v20, %v2321_v23 }
 0x178   : > { %v2869_v5 = vpop.eup %1942  ;;  %1950 = vtanh.f32 %v877_v60  ;;  %1407 = vmatprep.mubr.bf16.mxu1 %v1167_v9  ;;  %v1166_v7 = vpack.c.bf16 %v1118_v12, %v1116_v42  ;;  %v688_v52 = vmul.f32 %v624_v45, %v2853_v17  ;;  %v2874_v19 = vadd.f32 %v2760_v35, %v2319_v22 }
 0x179   : > { %v2876_v1 = vpop.eup %1944  ;;  %1952 = vtanh.f32 %v878_v37  ;;  %v625_v8 = vmul.f32 %v2867_v48, %v2867_v48  ;;  %v2882_v20 = vadd.f32 %v2772_v31, %v2321_v23  ;;  %v993_v11 = vadd.f32 1.0, %v2757_v29  ;;  %v2885_v4 = vpop.f32.mrb[60].mxu0 }
 0x17a   : > { %v2887_v56 = vpop.eup %1946  ;;  %1954 = vtanh.f32 %v879_v18  ;;  %1408 = vmatmul.mubr.bf16.gmra.mrb[28].mxu1 %v1166_v7  ;;  %v752_v35 = vmul.f32 0.044715, %v688_v52  ;;  %v626_v43 = vmul.f32 %v2874_v19, %v2874_v19  ;;  %v995_v61 = vadd.f32 1.0, %v2774_v24  ;;  %v2892_v16 = vpop.f32.mrb[61].mxu0 }
 0x17b   : > { %v689_v41 = vmul.f32 %v625_v8, %v2867_v48  ;;  %v627_v31 = vmul.f32 %v2882_v20, %v2882_v20  ;;  %v1057_v29 = vmul.f32 0.5, %v993_v11  ;;  %v992_v58 = vadd.f32 1.0, %v2739_v57  ;;  %v2898_v2 = vpop.f32.mrb[62].mxu0 }
 0x17c   : > { %v816_v40 = vadd.f32 %v752_v35, %v2853_v17  ;;  %v690_v49 = vmul.f32 %v626_v43, %v2874_v19  ;;  %v1059_v42 = vmul.f32 0.5, %v995_v61  ;;  %v994_v60 = vadd.f32 1.0, %v2762_v38  ;;  %v2903_v24 = vpop.f32.mrb[63].mxu0 }
 0x17d   : > { %v753_v9 = vmul.f32 0.044715, %v689_v41  ;;  %v691_v12 = vmul.f32 %v627_v31, %v2882_v20  ;;  %v1121_v45 = vmul.f32 %v1057_v29, %v2637_v6  ;;  %v1056_v37 = vmul.f32 0.5, %v992_v58 }
 0x17e   : > { %v880_v18 = vmul.f32 0.7978846, %v816_v40  ;;  %v754_v7 = vmul.f32 0.044715, %v690_v49  ;;  %v1123_v57 = vmul.f32 %v1059_v42, %v2645_v62  ;;  %v1058_v52 = vmul.f32 0.5, %v994_v60 }
 0x17f   : > { %v817_v8 = vadd.f32 %v753_v9, %v2867_v48  ;;  %v755_v11 = vmul.f32 0.044715, %v691_v12  ;;  %v1120_v35 = vmul.f32 %v1056_v37, %v2624_v21  ;;  %v2912_v38 = vadd.f32 %v2788_v44, %v2319_v22 }
 0x180   : > { %1956 = vtanh.f32 %v880_v18  ;;  %v818_v43 = vadd.f32 %v754_v7, %v2874_v19  ;;  %v1169_v61 = vpack.c.bf16 %v1123_v57, %v1121_v45  ;;  %v1122_v6 = vmul.f32 %v1058_v52, %v2640_v13 }
 0x181   : > { %v2916_v41 = vpop.eup %1948  ;;  %v881_v31 = vmul.f32 0.7978846, %v817_v8  ;;  %v819_v62 = vadd.f32 %v755_v11, %v2882_v20  ;;  %v628_v29 = vmul.f32 %v2912_v38, %v2912_v38  ;;  %v2923_v21 = vadd.f32 %v2793_v27, %v2321_v23 }
 0x182   : > { %v2925_v44 = vpop.eup %1950  ;;  %v882_v58 = vmul.f32 0.7978846, %v818_v43  ;;  %1415 = vmatprep.mubr.bf16.mxu1 %v1169_v61  ;;  %v1168_v40 = vpack.c.bf16 %v1122_v6, %v1120_v35  ;;  %v2929_v13 = vadd.f32 %v2800_v54, %v2319_v22  ;;  %v2933_v49 = vadd.f32 %v2809_v32, %v2321_v23 }
 0x183   : > { %v2935_v42 = vpop.eup %1952  ;;  %1958 = vtanh.f32 %v881_v31  ;;  %v883_v60 = vmul.f32 0.7978846, %v819_v62  ;;  %v692_v27 = vmul.f32 %v628_v29, %v2912_v38  ;;  %v629_v9 = vmul.f32 %v2923_v21, %v2923_v21 }
 0x184   : > { %v2940_v12 = vpop.eup %1954  ;;  %1960 = vtanh.f32 %v882_v58  ;;  %1416 = vmatmul.mubr.bf16.gmra.mrb[32].mxu1 %v1168_v40  ;;  %v630_v54 = vmul.f32 %v2929_v13, %v2929_v13  ;;  %v631_v32 = vmul.f32 %v2933_v49, %v2933_v49  ;;  %v997_v45 = vadd.f32 1.0, %v2811_v33 }
 0x185   : > { %1962 = vtanh.f32 %v883_v60  ;;  %v756_v37 = vmul.f32 0.044715, %v692_v27  ;;  %v693_v18 = vmul.f32 %v629_v9, %v2923_v21  ;;  %v999_v7 = vadd.f32 1.0, %v2828_v55 }
 0x186   : > { %v694_v57 = vmul.f32 %v630_v54, %v2929_v13  ;;  %v695_v52 = vmul.f32 %v631_v32, %v2933_v49  ;;  %v1061_v8 = vmul.f32 0.5, %v997_v45  ;;  %v996_v11 = vadd.f32 1.0, %v2802_v36 }
 0x187   : > { %v820_v35 = vadd.f32 %v756_v37, %v2912_v38  ;;  %v757_v43 = vmul.f32 0.044715, %v693_v18  ;;  %v1063_v61 = vmul.f32 0.5, %v999_v7  ;;  %v998_v6 = vadd.f32 1.0, %v2823_v51 }
 0x188   : > { %v758_v33 = vmul.f32 0.044715, %v694_v57  ;;  %v759_v31 = vmul.f32 0.044715, %v695_v52  ;;  %v1125_v62 = vmul.f32 %v1061_v8, %v2689_v63  ;;  %v1060_v29 = vmul.f32 0.5, %v996_v11 }
 0x189   : > { %v884_v58 = vmul.f32 0.7978846, %v820_v35  ;;  %v821_v55 = vadd.f32 %v757_v43, %v2923_v21  ;;  %v1127_v40 = vmul.f32 %v1063_v61, %v2705_v10  ;;  %v1062_v60 = vmul.f32 0.5, %v998_v6 }
 0x18a   : > { %v2957_v27 = vpop.eup %1956  ;;  %v822_v36 = vadd.f32 %v758_v33, %v2929_v13  ;;  %v823_v9 = vadd.f32 %v759_v31, %v2933_v49  ;;  %v1124_v54 = vmul.f32 %v1060_v29, %v2685_v39  ;;  %v2964_v51 = vadd.f32 %v2840_v30, %v2319_v22 }
 0x18b   : > { %1964 = vtanh.f32 %v884_v58  ;;  %v885_v63 = vmul.f32 0.7978846, %v821_v55  ;;  %v1171_v32 = vpack.c.bf16 %v1127_v40, %v1125_v62  ;;  %v1126_v45 = vmul.f32 %v1062_v60, %v2697_v47 }
 0x18c   : > { %v886_v37 = vmul.f32 0.7978846, %v822_v36  ;;  %v887_v10 = vmul.f32 0.7978846, %v823_v9  ;;  %v632_v18 = vmul.f32 %v2964_v51, %v2964_v51  ;;  %v2971_v7 = vadd.f32 %v2844_v25, %v2321_v23 }
 0x18d   : > { %v2973_v57 = vpop.eup %1958  ;;  %1966 = vtanh.f32 %v885_v63  ;;  %1423 = vmatprep.mubr.bf16.mxu1 %v1171_v32  ;;  %v1170_v39 = vpack.c.bf16 %v1126_v45, %v1124_v54  ;;  %v2977_v30 = vadd.f32 %v2847_v59, %v2319_v22  ;;  %v2981_v47 = vadd.f32 %v2855_v0, %v2321_v23 }
 0x18e   : > { %v2983_v52 = vpop.eup %1960  ;;  %1968 = vtanh.f32 %v886_v37  ;;  %v696_v8 = vmul.f32 %v632_v18, %v2964_v51  ;;  %v633_v25 = vmul.f32 %v2971_v7, %v2971_v7  ;;  %v1001_v11 = vadd.f32 1.0, %v2869_v5 }
 0x18f   : > { %v2989_v35 = vpop.eup %1962  ;;  %1970 = vtanh.f32 %v887_v10  ;;  %1424 = vmatmul.mubr.bf16.gmra.mrb[36].mxu1 %v1170_v39  ;;  %v634_v59 = vmul.f32 %v2977_v30, %v2977_v30  ;;  %v635_v0 = vmul.f32 %v2981_v47, %v2981_v47  ;;  %v1003_v43 = vadd.f32 1.0, %v2887_v56 }
 0x190   : > { %v760_v61 = vmul.f32 0.044715, %v696_v8  ;;  %v697_v6 = vmul.f32 %v633_v25, %v2971_v7  ;;  %v1065_v33 = vmul.f32 0.5, %v1001_v11  ;;  %v1000_v31 = vadd.f32 1.0, %v2857_v14 }
 0x191   : > { %v698_v5 = vmul.f32 %v634_v59, %v2977_v30  ;;  %v699_v62 = vmul.f32 %v635_v0, %v2981_v47  ;;  %v1067_v29 = vmul.f32 0.5, %v1003_v43  ;;  %v1002_v58 = vadd.f32 1.0, %v2876_v1 }
 0x192   : > { %v824_v55 = vadd.f32 %v760_v61, %v2964_v51  ;;  %v761_v40 = vmul.f32 0.044715, %v697_v6  ;;  %v1129_v60 = vmul.f32 %v1065_v33, %v2749_v26  ;;  %v1064_v36 = vmul.f32 0.5, %v1000_v31 }
 0x193   : > { %v762_v56 = vmul.f32 0.044715, %v698_v5  ;;  %v763_v9 = vmul.f32 0.044715, %v699_v62  ;;  %v1131_v54 = vmul.f32 %v1067_v29, %v2770_v3  ;;  %v1066_v63 = vmul.f32 0.5, %v1002_v58 }
 0x194   : > { %v888_v32 = vmul.f32 0.7978846, %v824_v55  ;;  %v825_v14 = vadd.f32 %v761_v40, %v2971_v7  ;;  %v1128_v45 = vmul.f32 %v1064_v36, %v2735_v15  ;;  %v3008_v37 = vadd.f32 %v2885_v4, %v2319_v22 }
 0x195   : > { %v3010_v1 = vpop.eup %1964  ;;  %v826_v10 = vadd.f32 %v762_v56, %v2977_v30  ;;  %v827_v26 = vadd.f32 %v763_v9, %v2981_v47  ;;  %v1173_v18 = vpack.c.bf16 %v1131_v54, %v1129_v60  ;;  %v1130_v39 = vmul.f32 %v1066_v63, %v2753_v34 }
 0x196   : > { %1972 = vtanh.f32 %v888_v32  ;;  %v889_v3 = vmul.f32 0.7978846, %v825_v14  ;;  %v636_v8 = vmul.f32 %v3008_v37, %v3008_v37  ;;  %v3019_v15 = vadd.f32 %v2892_v16, %v2321_v23 }
 0x197   : > { %v3021_v4 = vpop.eup %1966  ;;  %v890_v25 = vmul.f32 0.7978846, %v826_v10  ;;  %v891_v11 = vmul.f32 0.7978846, %v827_v26  ;;  %1431 = vmatprep.mubr.bf16.mxu1 %v1173_v18  ;;  %v1172_v59 = vpack.c.bf16 %v1130_v39, %v1128_v45  ;;  %v3025_v0 = vadd.f32 %v2898_v2, %v2319_v22 }
 0x198   : > { %v3027_v34 = vpop.eup %1968  ;;  %1974 = vtanh.f32 %v889_v3  ;;  %v700_v43 = vmul.f32 %v636_v8, %v3008_v37  ;;  %v637_v61 = vmul.f32 %v3019_v15, %v3019_v15  ;;  %v3034_v16 = vadd.f32 %v2903_v24, %v2321_v23 }
 0x199   : > { %v1971_v6 = vpop.eup %1970  ;;  %1976 = vtanh.f32 %v890_v25  ;;  %1432 = vmatmul.mubr.bf16.gmra.mrb[40].mxu1 %v1172_v59  ;;  %v638_v33 = vmul.f32 %v3025_v0, %v3025_v0  ;;  %v1005_v22 = vadd.f32 1.0, %v2925_v44  ;;  %v1007_v2 = vadd.f32 1.0, %v2940_v12 }
 0x19a   : > { %1978 = vtanh.f32 %v891_v11  ;;  %v764_v31 = vmul.f32 0.044715, %v700_v43  ;;  %v701_v5 = vmul.f32 %v637_v61, %v3019_v15  ;;  %v639_v62 = vmul.f32 %v3034_v16, %v3034_v16 }
 0x19b   : > { %v702_v23 = vmul.f32 %v638_v33, %v3025_v0  ;;  %v1069_v24 = vmul.f32 0.5, %v1005_v22  ;;  %v1071_v29 = vmul.f32 0.5, %v1007_v2  ;;  %v1004_v58 = vadd.f32 1.0, %v2916_v41 }
 0x19c   : > { %v828_v55 = vadd.f32 %v764_v31, %v3008_v37  ;;  %v765_v40 = vmul.f32 0.044715, %v701_v5  ;;  %v703_v44 = vmul.f32 %v639_v62, %v3034_v16  ;;  %v1006_v12 = vadd.f32 1.0, %v2935_v42 }
 0x19d   : > { %v766_v60 = vmul.f32 0.044715, %v702_v23  ;;  %v1133_v36 = vmul.f32 %v1069_v24, %v2807_v28  ;;  %v1135_v56 = vmul.f32 %v1071_v29, %v2821_v50  ;;  %v1068_v9 = vmul.f32 0.5, %v1004_v58 }
 0x19e   : > { %v892_v54 = vmul.f32 0.7978846, %v828_v55  ;;  %v829_v63 = vadd.f32 %v765_v40, %v3019_v15  ;;  %v767_v32 = vmul.f32 0.044715, %v703_v44  ;;  %v1070_v14 = vmul.f32 0.5, %v1006_v12 }
 0x19f   : > { %v830_v41 = vadd.f32 %v766_v60, %v3025_v0  ;;  %v1175_v45 = vpack.c.bf16 %v1135_v56, %v1133_v36  ;;  %v1132_v10 = vmul.f32 %v1068_v9, %v2798_v53  ;;  %v1009_v26 = vadd.f32 1.0, %v2973_v57 }
 0x1a0   : > { %v1973_v18 = vpop.eup %1972  ;;  %1980 = vtanh.f32 %v892_v54  ;;  %v893_v42 = vmul.f32 0.7978846, %v829_v63  ;;  %v831_v28 = vadd.f32 %v767_v32, %v3034_v16  ;;  %v1134_v50 = vmul.f32 %v1070_v14, %v2817_v46 }
 0x1a1   : > { %v894_v39 = vmul.f32 0.7978846, %v830_v41  ;;  %1439 = vmatprep.mubr.bf16.mxu1 %v1175_v45  ;;  %v1011_v3 = vadd.f32 1.0, %v2989_v35  ;;  %v1073_v8 = vmul.f32 0.5, %v1009_v26  ;;  %v1008_v25 = vadd.f32 1.0, %v2957_v27 }
 0x1a2   : > { %v1975_v11 = vpop.eup %1974  ;;  %1982 = vtanh.f32 %v893_v42  ;;  %v895_v59 = vmul.f32 0.7978846, %v831_v28  ;;  %v1174_v53 = vpack.c.bf16 %v1134_v50, %v1132_v10  ;;  %v1010_v57 = vadd.f32 1.0, %v2983_v52 }
 0x1a3   : > { %v1977_v43 = vpop.eup %1976  ;;  %1984 = vtanh.f32 %v894_v39  ;;  %v1075_v61 = vmul.f32 0.5, %v1011_v3  ;;  %v1137_v33 = vmul.f32 %v1073_v8, %v2867_v48  ;;  %v1072_v22 = vmul.f32 0.5, %v1008_v25 }
 0x1a4   : > { %v1979_v46 = vpop.eup %1978  ;;  %1986 = vtanh.f32 %v895_v59  ;;  %1440 = vmatmul.mubr.bf16.gmra.mrb[44].mxu1 %v1174_v53  ;;  %v1074_v2 = vmul.f32 0.5, %v1010_v57  ;;  %v1013_v35 = vadd.f32 1.0, %v3021_v4  ;;  %v1015_v31 = vadd.f32 1.0, %v1971_v6 }
 0x1a5   : > { %v1139_v27 = vmul.f32 %v1075_v61, %v2882_v20  ;;  %v1136_v5 = vmul.f32 %v1072_v22, %v2853_v17  ;;  %v1012_v62 = vadd.f32 1.0, %v3010_v1  ;;  %v1014_v52 = vadd.f32 1.0, %v3027_v34  ;;  %v1988_v61 = vld [vmem:[%s2216_s8] sm:$0xff] }
 0x1a6   : > { %v1138_v23 = vmul.f32 %v1074_v2, %v2874_v19  ;;  %v1077_v24 = vmul.f32 0.5, %v1013_v35  ;;  %v1079_v48 = vmul.f32 0.5, %v1015_v31  ;;  %v1017_v29 = vadd.f32 1.0, %v1975_v11 }
 0x1a7   : > { %v1177_v58 = vpack.c.bf16 %v1139_v27, %v1137_v33  ;;  %v1076_v55 = vmul.f32 0.5, %v1012_v62  ;;  %v1078_v40 = vmul.f32 0.5, %v1014_v52  ;;  %v1019_v44 = vadd.f32 1.0, %v1979_v46  ;;  %v1989_v46 = vld [vmem:[%s2216_s8 + $0x8] sm:$0xff] }
 0x1a8   : > { %v1176_v12 = vpack.c.bf16 %v1138_v23, %v1136_v5  ;;  %v1141_v4 = vmul.f32 %v1077_v24, %v2923_v21  ;;  %v1143_v20 = vmul.f32 %v1079_v48, %v2933_v49  ;;  %v1081_v6 = vmul.f32 0.5, %v1017_v29  ;;  %v1990_v24 = vld [vmem:[%s2216_s8 + $0x10] sm:$0xff] }
 0x1a9   : > { %1447 = vmatprep.mubr.bf16.mxu1 %v1177_v58  ;;  %v1140_v17 = vmul.f32 %v1076_v55, %v2912_v38  ;;  %v1142_v1 = vmul.f32 %v1078_v40, %v2929_v13  ;;  %v1083_v34 = vmul.f32 0.5, %v1019_v44  ;;  %v1016_v19 = vadd.f32 1.0, %v1973_v18  ;;  %v1991_v58 = vld [vmem:[%s2216_s8 + $0x18] sm:$0xff] }
 0x1aa   : > { %v1981_v60 = vpop.eup %1980  ;;  %v1179_v36 = vpack.c.bf16 %v1143_v20, %v1141_v4  ;;  %v1145_v56 = vmul.f32 %v1081_v6, %v2971_v7  ;;  %v1018_v9 = vadd.f32 1.0, %v1977_v43 }
 0x1ab   : > { %v1178_v54 = vpack.c.bf16 %v1142_v1, %v1140_v17  ;;  %v1147_v63 = vmul.f32 %v1083_v34, %v2981_v47  ;;  %v1080_v32 = vmul.f32 0.5, %v1016_v19  ;;  %v1020_v21 = vadd.f32 1.0, %v1981_v60  ;;  %v1992_v1 = vld [vmem:[%s2216_s8 + $0x20] sm:$0xff]  ;;  %v1993_v60 = vld [vmem:[%s2216_s8 + $0x28] sm:$0xff] }
 0x1ac   : > { %v1983_v14 = vpop.eup %1982  ;;  %1448 = vmatmul.mubr.bf16.gmra.mrb[48].mxu1 %v1176_v12  ;;  %v1082_v49 = vmul.f32 0.5, %v1018_v9 }
 0x1ad   : > { %v1985_v41 = vpop.eup %1984  ;;  %1455 = vmatprep.mubr.bf16.mxu1 %v1179_v36  ;;  %v1181_v38 = vpack.c.bf16 %v1147_v63, %v1145_v56  ;;  %v1021_v45 = vadd.f32 1.0, %v1983_v14  ;;  %v1144_v10 = vmul.f32 %v1080_v32, %v2964_v51  ;;  %v1084_v7 = vmul.f32 0.5, %v1020_v21 }
 0x1ae   : > { %v1987_v13 = vpop.eup %1986  ;;  %v1146_v26 = vmul.f32 %v1082_v49, %v2977_v30  ;;  %v1022_v18 = vadd.f32 1.0, %v1985_v41  ;;  %v1994_v49 = vld [vmem:[%s2216_s8 + $0x30] sm:$0xff] }
 0x1af   : > { %v1023_v42 = vadd.f32 1.0, %v1987_v13  ;;  %v1085_v28 = vmul.f32 0.5, %v1021_v45  ;;  %v1148_v3 = vmul.f32 %v1084_v7, %v3008_v37  ;;  %v3082_v37 = vld [vmem:[%s3240_s4] ss:$0 sm:$0xff]  ;;  %v1995_v45 = vld [vmem:[%s2216_s8 + $0x38] sm:$0xff] }
 0x1b0   : > { %v1180_v47 = vpack.c.bf16 %v1146_v26, %v1144_v10  ;;  %v1086_v50 = vmul.f32 0.5, %v1022_v18 }
 0x1b1   : > { %v1087_v39 = vmul.f32 0.5, %v1023_v42  ;;  %v1149_v25 = vmul.f32 %v1085_v28, %v3019_v15 }
 0x1b2   : > { %v1150_v8 = vmul.f32 %v1086_v50, %v3025_v0  ;;  %v1996_v50 = vld [vmem:[%s2216_s8 + $0x40] sm:$0xff] }
 0x1b3   : > { %v1151_v11 = vmul.f32 %v1087_v39, %v3034_v16 }
 0x1b4   : > { %1456 = vmatmul.mubr.bf16.gmra.mrb[52].mxu1 %v1178_v54  ;;  %v1182_v51 = vpack.c.bf16 %v1150_v8, %v1148_v3  ;;  %v1997_v8 = vld [vmem:[%s2216_s8 + $0x48] sm:$0xff] }
 0x1b5   : > { %1463 = vmatprep.mubr.bf16.mxu1 %v1181_v38  ;;  %v1183_v30 = vpack.c.bf16 %v1151_v11, %v1149_v25 }
 0x1bc   : > { %1464 = vmatmul.mubr.bf16.gmra.mrb[56].mxu1 %v1180_v47 }
 0x1bd   : > { %1471 = vmatprep.mubr.bf16.mxu1 %v1183_v30 }
 0x1c4   : > { %1472 = vmatmul.mubr.bf16.gmra.mrb[60].mxu1 %v1182_v51 }
 0x203   : > { %v1682_v59 = vpop.f32.mrb[0].mxu1 }
 0x204   : > { %v1683_v0 = vpop.f32.mrb[1].mxu1 }
 0x205   : > { %v1684_v15 = vadd.f32 %v1683_v0, %v1682_v59  ;;  %v1685_v16 = vpop.f32.mrb[2].mxu1 }
 0x206   : > { %v1686_v53 = vpop.f32.mrb[3].mxu1 }
 0x207   : > { %v1354_v57 = vadd.f32 %v1684_v15, %v3082_v37  ;;  %v1687_v43 = vadd.f32 %v1686_v53, %v1685_v16  ;;  %v1998_v53 = vld [vmem:[%s2216_s8 + $0x50] sm:$0xff] }
 0x209   : > { %v1480_v33 = vadd.f32 %v1988_v61, %v1354_v57  ;;  %v1357_v22 = vadd.f32 %v1687_v43, %v3082_v37  ;;  %v1999_v61 = vld [vmem:[%s2216_s8 + $0x58] sm:$0xff] }
 0x20b   : > { %1512 = vst [vmem:[%s3089_s23] sm:$0xff] %v1480_v33  ;;  %v1481_v2 = vadd.f32 %v1989_v46, %v1357_v22 }
 0x20d   : > { %1513 = vst [vmem:[%s3089_s23 + $0x8] sm:$0xff] %v1481_v2 }
 0x20e   : > { %v1688_v35 = vpop.f32.mrb[4].mxu1 }
 0x20f   : > { %v1689_v31 = vpop.f32.mrb[5].mxu1 }
 0x210   : > { %v1690_v27 = vadd.f32 %v1689_v31, %v1688_v35  ;;  %v1691_v5 = vpop.f32.mrb[6].mxu1 }
 0x211   : > { %v1692_v62 = vpop.f32.mrb[7].mxu1 }
 0x212   : > { %v1362_v52 = vadd.f32 %v1690_v27, %v3082_v37  ;;  %v1693_v23 = vadd.f32 %v1692_v62, %v1691_v5  ;;  %v2000_v62 = vld [vmem:[%s2216_s8 + $0x60] sm:$0xff] }
 0x214   : > { %v1482_v48 = vadd.f32 %v1990_v24, %v1362_v52  ;;  %v1365_v29 = vadd.f32 %v1693_v23, %v3082_v37  ;;  %v2001_v24 = vld [vmem:[%s2216_s8 + $0x68] sm:$0xff] }
 0x216   : > { %1514 = vst [vmem:[%s3089_s23 + $0x10] sm:$0xff] %v1482_v48  ;;  %v1483_v55 = vadd.f32 %v1991_v58, %v1365_v29 }
 0x218   : > { %1515 = vst [vmem:[%s3089_s23 + $0x18] sm:$0xff] %v1483_v55  ;;  %v1694_v40 = vpop.f32.mrb[8].mxu1 }
 0x219   : > { %v1695_v44 = vpop.f32.mrb[9].mxu1 }
 0x21a   : > { %v1696_v12 = vadd.f32 %v1695_v44, %v1694_v40  ;;  %v1697_v4 = vpop.f32.mrb[10].mxu1 }
 0x21b   : > { %v1698_v20 = vpop.f32.mrb[11].mxu1 }
 0x21c   : > { %v1370_v6 = vadd.f32 %v1696_v12, %v3082_v37  ;;  %v1699_v17 = vadd.f32 %v1698_v20, %v1697_v4  ;;  %v2002_v20 = vld [vmem:[%s2216_s8 + $0x70] sm:$0xff] }
 0x21e   : > { %v1484_v34 = vadd.f32 %v1992_v1, %v1370_v6  ;;  %v1373_v19 = vadd.f32 %v1699_v17, %v3082_v37  ;;  %v2003_v1 = vld [vmem:[%s2216_s8 + $0x78] sm:$0xff] }
 0x220   : > { %1516 = vst [vmem:[%s3089_s23 + $0x20] sm:$0xff] %v1484_v34  ;;  %v1485_v36 = vadd.f32 %v1993_v60, %v1373_v19 }
 0x222   : > { %1517 = vst [vmem:[%s3089_s23 + $0x28] sm:$0xff] %v1485_v36 }
 0x223   : > { %v1700_v56 = vpop.f32.mrb[12].mxu1 }
 0x224   : > { %v1701_v9 = vpop.f32.mrb[13].mxu1 }
 0x225   : > { %v1702_v54 = vadd.f32 %v1701_v9, %v1700_v56  ;;  %v1703_v63 = vpop.f32.mrb[14].mxu1 }
 0x226   : > { %v1704_v32 = vpop.f32.mrb[15].mxu1 }
 0x227   : > { %v1378_v21 = vadd.f32 %v1702_v54, %v3082_v37  ;;  %v1705_v14 = vadd.f32 %v1704_v32, %v1703_v63  ;;  %v2004_v32 = vld [vmem:[%s2216_s8 + $0x80] sm:$0xff] }
 0x229   : > { %v1486_v41 = vadd.f32 %v1994_v49, %v1378_v21  ;;  %v1381_v38 = vadd.f32 %v1705_v14, %v3082_v37  ;;  %v2005_v49 = vld [vmem:[%s2216_s8 + $0x88] sm:$0xff] }
 0x22b   : > { %1518 = vst [vmem:[%s3089_s23 + $0x30] sm:$0xff] %v1486_v41  ;;  %v1487_v13 = vadd.f32 %v1995_v45, %v1381_v38 }
 0x22d   : > { %1519 = vst [vmem:[%s3089_s23 + $0x38] sm:$0xff] %v1487_v13  ;;  %v1706_v10 = vpop.f32.mrb[16].mxu1 }
 0x22e   : > { %v1707_v26 = vpop.f32.mrb[17].mxu1 }
 0x22f   : > { %v1708_v18 = vadd.f32 %v1707_v26, %v1706_v10  ;;  %v1709_v7 = vpop.f32.mrb[18].mxu1 }
 0x230   : > { %v1710_v42 = vpop.f32.mrb[19].mxu1 }
 0x231   : > { %v1386_v28 = vadd.f32 %v1708_v18, %v3082_v37  ;;  %v1711_v47 = vadd.f32 %v1710_v42, %v1709_v7  ;;  %v2006_v42 = vld [vmem:[%s2216_s8 + $0x90] sm:$0xff] }
 0x233   : > { %v1488_v39 = vadd.f32 %v1996_v50, %v1386_v28  ;;  %v1389_v3 = vadd.f32 %v1711_v47, %v3082_v37  ;;  %v2007_v50 = vld [vmem:[%s2216_s8 + $0x98] sm:$0xff] }
 0x235   : > { %1520 = vst [vmem:[%s3089_s23 + $0x40] sm:$0xff] %v1488_v39  ;;  %v1489_v25 = vadd.f32 %v1997_v8, %v1389_v3 }
 0x237   : > { %1521 = vst [vmem:[%s3089_s23 + $0x48] sm:$0xff] %v1489_v25 }
 0x238   : > { %v1712_v11 = vpop.f32.mrb[20].mxu1 }
 0x239   : > { %v1713_v51 = vpop.f32.mrb[21].mxu1 }
 0x23a   : > { %v1714_v30 = vadd.f32 %v1713_v51, %v1712_v11  ;;  %v1715_v59 = vpop.f32.mrb[22].mxu1 }
 0x23b   : > { %v1716_v0 = vpop.f32.mrb[23].mxu1 }
 0x23c   : > { %v1394_v15 = vadd.f32 %v1714_v30, %v3082_v37  ;;  %v1717_v16 = vadd.f32 %v1716_v0, %v1715_v59  ;;  %v2008_v0 = vld [vmem:[%s2216_s8 + $0xa0] sm:$0xff] }
 0x23e   : > { %v1490_v57 = vadd.f32 %v1998_v53, %v1394_v15  ;;  %v1397_v43 = vadd.f32 %v1717_v16, %v3082_v37  ;;  %v2009_v53 = vld [vmem:[%s2216_s8 + $0xa8] sm:$0xff] }
 0x240   : > { %1522 = vst [vmem:[%s3089_s23 + $0x50] sm:$0xff] %v1490_v57  ;;  %v1491_v33 = vadd.f32 %v1999_v61, %v1397_v43 }
 0x242   : > { %1523 = vst [vmem:[%s3089_s23 + $0x58] sm:$0xff] %v1491_v33  ;;  %v1718_v22 = vpop.f32.mrb[24].mxu1 }
 0x243   : > { %v1719_v46 = vpop.f32.mrb[25].mxu1 }
 0x244   : > { %v1720_v2 = vadd.f32 %v1719_v46, %v1718_v22  ;;  %v1721_v35 = vpop.f32.mrb[26].mxu1 }
 0x245   : > { %v1722_v31 = vpop.f32.mrb[27].mxu1 }
 0x246   : > { %v1402_v27 = vadd.f32 %v1720_v2, %v3082_v37  ;;  %v1723_v5 = vadd.f32 %v1722_v31, %v1721_v35  ;;  %v2010_v31 = vld [vmem:[%s2216_s8 + $0xb0] sm:$0xff] }
 0x248   : > { %v1492_v52 = vadd.f32 %v2000_v62, %v1402_v27  ;;  %v1405_v23 = vadd.f32 %v1723_v5, %v3082_v37  ;;  %v2011_v62 = vld [vmem:[%s2216_s8 + $0xb8] sm:$0xff] }
 0x24a   : > { %1524 = vst [vmem:[%s3089_s23 + $0x60] sm:$0xff] %v1492_v52  ;;  %v1493_v48 = vadd.f32 %v2001_v24, %v1405_v23 }
 0x24c   : > { %1525 = vst [vmem:[%s3089_s23 + $0x68] sm:$0xff] %v1493_v48 }
 0x24d   : > { %v1724_v29 = vpop.f32.mrb[28].mxu1 }
 0x24e   : > { %v1725_v58 = vpop.f32.mrb[29].mxu1 }
 0x24f   : > { %v1726_v55 = vadd.f32 %v1725_v58, %v1724_v29  ;;  %v1727_v40 = vpop.f32.mrb[30].mxu1 }
 0x250   : > { %v1728_v44 = vpop.f32.mrb[31].mxu1 }
 0x251   : > { %v1410_v12 = vadd.f32 %v1726_v55, %v3082_v37  ;;  %v1729_v4 = vadd.f32 %v1728_v44, %v1727_v40  ;;  %v2012_v44 = vld [vmem:[%s2216_s8 + $0xc0] sm:$0xff] }
 0x253   : > { %v1494_v6 = vadd.f32 %v2002_v20, %v1410_v12  ;;  %v1413_v17 = vadd.f32 %v1729_v4, %v3082_v37  ;;  %v2013_v20 = vld [vmem:[%s2216_s8 + $0xc8] sm:$0xff] }
 0x255   : > { %1526 = vst [vmem:[%s3089_s23 + $0x70] sm:$0xff] %v1494_v6  ;;  %v1495_v34 = vadd.f32 %v2003_v1, %v1413_v17 }
 0x257   : > { %1527 = vst [vmem:[%s3089_s23 + $0x78] sm:$0xff] %v1495_v34  ;;  %v1730_v19 = vpop.f32.mrb[32].mxu1 }
 0x258   : > { %v1731_v60 = vpop.f32.mrb[33].mxu1 }
 0x259   : > { %v1732_v36 = vadd.f32 %v1731_v60, %v1730_v19  ;;  %v1733_v56 = vpop.f32.mrb[34].mxu1 }
 0x25a   : > { %v1734_v9 = vpop.f32.mrb[35].mxu1 }
 0x25b   : > { %v1418_v54 = vadd.f32 %v1732_v36, %v3082_v37  ;;  %v1735_v63 = vadd.f32 %v1734_v9, %v1733_v56  ;;  %v2014_v9 = vld [vmem:[%s2216_s8 + $0xd0] sm:$0xff] }
 0x25d   : > { %v1496_v21 = vadd.f32 %v2004_v32, %v1418_v54  ;;  %v1421_v14 = vadd.f32 %v1735_v63, %v3082_v37  ;;  %v2015_v32 = vld [vmem:[%s2216_s8 + $0xd8] sm:$0xff] }
 0x25f   : > { %1528 = vst [vmem:[%s3089_s23 + $0x80] sm:$0xff] %v1496_v21  ;;  %v1497_v41 = vadd.f32 %v2005_v49, %v1421_v14 }
 0x261   : > { %1529 = vst [vmem:[%s3089_s23 + $0x88] sm:$0xff] %v1497_v41 }
 0x262   : > { %v1736_v38 = vpop.f32.mrb[36].mxu1 }
 0x263   : > { %v1737_v45 = vpop.f32.mrb[37].mxu1 }
 0x264   : > { %v1738_v13 = vadd.f32 %v1737_v45, %v1736_v38  ;;  %v1739_v10 = vpop.f32.mrb[38].mxu1 }
 0x265   : > { %v1740_v26 = vpop.f32.mrb[39].mxu1 }
 0x266   : > { %v1426_v18 = vadd.f32 %v1738_v13, %v3082_v37  ;;  %v1741_v7 = vadd.f32 %v1740_v26, %v1739_v10  ;;  %v2016_v26 = vld [vmem:[%s2216_s8 + $0xe0] sm:$0xff] }
 0x268   : > { %v1498_v28 = vadd.f32 %v2006_v42, %v1426_v18  ;;  %v1429_v47 = vadd.f32 %v1741_v7, %v3082_v37  ;;  %v2017_v42 = vld [vmem:[%s2216_s8 + $0xe8] sm:$0xff] }
 0x26a   : > { %1530 = vst [vmem:[%s3089_s23 + $0x90] sm:$0xff] %v1498_v28  ;;  %v1499_v39 = vadd.f32 %v2007_v50, %v1429_v47 }
 0x26c   : > { %1531 = vst [vmem:[%s3089_s23 + $0x98] sm:$0xff] %v1499_v39  ;;  %v1742_v3 = vpop.f32.mrb[40].mxu1 }
 0x26d   : > { %v1743_v8 = vpop.f32.mrb[41].mxu1 }
 0x26e   : > { %v1744_v25 = vadd.f32 %v1743_v8, %v1742_v3  ;;  %v1745_v11 = vpop.f32.mrb[42].mxu1 }
 0x26f   : > { %v1746_v51 = vpop.f32.mrb[43].mxu1 }
 0x270   : > { %v1434_v30 = vadd.f32 %v1744_v25, %v3082_v37  ;;  %v1747_v59 = vadd.f32 %v1746_v51, %v1745_v11  ;;  %v2018_v51 = vld [vmem:[%s2216_s8 + $0xf0] sm:$0xff] }
 0x272   : > { %v1500_v15 = vadd.f32 %v2008_v0, %v1434_v30  ;;  %v1437_v16 = vadd.f32 %v1747_v59, %v3082_v37  ;;  %v2019_v0 = vld [vmem:[%s2216_s8 + $0xf8] sm:$0xff] }
 0x274   : > { %1532 = vst [vmem:[%s3089_s23 + $0xa0] sm:$0xff] %v1500_v15  ;;  %v1501_v57 = vadd.f32 %v2009_v53, %v1437_v16 }
 0x276   : > { %1533 = vst [vmem:[%s3089_s23 + $0xa8] sm:$0xff] %v1501_v57 }
 0x277   : > { %v1748_v43 = vpop.f32.mrb[44].mxu1 }
 0x278   : > { %v1749_v61 = vpop.f32.mrb[45].mxu1 }
 0x279   : > { %v1750_v33 = vadd.f32 %v1749_v61, %v1748_v43  ;;  %v1751_v22 = vpop.f32.mrb[46].mxu1 }
 0x27a   : > { %v1752_v46 = vpop.f32.mrb[47].mxu1 }
 0x27b   : > { %v1442_v2 = vadd.f32 %v1750_v33, %v3082_v37  ;;  %v1753_v35 = vadd.f32 %v1752_v46, %v1751_v22 }
 0x27d   : > { %v1502_v27 = vadd.f32 %v2010_v31, %v1442_v2  ;;  %v1445_v5 = vadd.f32 %v1753_v35, %v3082_v37 }
 0x27f   : > { %1534 = vst [vmem:[%s3089_s23 + $0xb0] sm:$0xff] %v1502_v27  ;;  %v1503_v52 = vadd.f32 %v2011_v62, %v1445_v5  ;;  %v1754_v23 = vpop.f32.mrb[48].mxu1 }
 0x280   : > { %v1755_v24 = vpop.f32.mrb[49].mxu1 }
 0x281   : > { %1535 = vst [vmem:[%s3089_s23 + $0xb8] sm:$0xff] %v1503_v52  ;;  %v1756_v48 = vadd.f32 %v1755_v24, %v1754_v23  ;;  %v1757_v29 = vpop.f32.mrb[50].mxu1 }
 0x282   : > { %v1758_v58 = vpop.f32.mrb[51].mxu1 }
 0x283   : > { %v1450_v55 = vadd.f32 %v1756_v48, %v3082_v37  ;;  %v1759_v40 = vadd.f32 %v1758_v58, %v1757_v29 }
 0x285   : > { %v1504_v12 = vadd.f32 %v2012_v44, %v1450_v55  ;;  %v1453_v4 = vadd.f32 %v1759_v40, %v3082_v37 }
 0x287   : > { %1536 = vst [vmem:[%s3089_s23 + $0xc0] sm:$0xff] %v1504_v12  ;;  %v1505_v6 = vadd.f32 %v2013_v20, %v1453_v4  ;;  %v1760_v17 = vpop.f32.mrb[52].mxu1 }
 0x288   : > { %v1761_v1 = vpop.f32.mrb[53].mxu1 }
 0x289   : > { %1537 = vst [vmem:[%s3089_s23 + $0xc8] sm:$0xff] %v1505_v6  ;;  %v1762_v34 = vadd.f32 %v1761_v1, %v1760_v17  ;;  %v1763_v19 = vpop.f32.mrb[54].mxu1 }
 0x28a   : > { %v1764_v60 = vpop.f32.mrb[55].mxu1 }
 0x28b   : > { %v1458_v36 = vadd.f32 %v1762_v34, %v3082_v37  ;;  %v1765_v56 = vadd.f32 %v1764_v60, %v1763_v19 }
 0x28d   : > { %v1506_v54 = vadd.f32 %v2014_v9, %v1458_v36  ;;  %v1461_v63 = vadd.f32 %v1765_v56, %v3082_v37 }
 0x28f   : > { %1538 = vst [vmem:[%s3089_s23 + $0xd0] sm:$0xff] %v1506_v54  ;;  %v1507_v21 = vadd.f32 %v2015_v32, %v1461_v63  ;;  %v1766_v14 = vpop.f32.mrb[56].mxu1 }
 0x290   : > { %v1767_v49 = vpop.f32.mrb[57].mxu1 }
 0x291   : > { %1539 = vst [vmem:[%s3089_s23 + $0xd8] sm:$0xff] %v1507_v21  ;;  %v1768_v41 = vadd.f32 %v1767_v49, %v1766_v14  ;;  %v1769_v38 = vpop.f32.mrb[58].mxu1 }
 0x292   : > { %v1770_v45 = vpop.f32.mrb[59].mxu1 }
 0x293   : > { %v1466_v13 = vadd.f32 %v1768_v41, %v3082_v37  ;;  %v1771_v10 = vadd.f32 %v1770_v45, %v1769_v38 }
 0x295   : > { %v1508_v18 = vadd.f32 %v2016_v26, %v1466_v13  ;;  %v1469_v7 = vadd.f32 %v1771_v10, %v3082_v37 }
 0x297   : > { %1540 = vst [vmem:[%s3089_s23 + $0xe0] sm:$0xff] %v1508_v18  ;;  %v1509_v28 = vadd.f32 %v2017_v42, %v1469_v7  ;;  %v1772_v47 = vpop.f32.mrb[60].mxu1 }
 0x298   : > { %v1773_v50 = vpop.f32.mrb[61].mxu1 }
 0x299   : > { %1541 = vst [vmem:[%s3089_s23 + $0xe8] sm:$0xff] %v1509_v28  ;;  %v1774_v39 = vadd.f32 %v1773_v50, %v1772_v47  ;;  %v1775_v3 = vpop.f32.mrb[62].mxu1 }
 0x29a   : > { %v1776_v8 = vpop.f32.mrb[63].mxu1 }
 0x29b   : > { %v1474_v25 = vadd.f32 %v1774_v39, %v3082_v37  ;;  %v1777_v11 = vadd.f32 %v1776_v8, %v1775_v3 }
 0x29d   : > { %v1510_v30 = vadd.f32 %v2018_v51, %v1474_v25  ;;  %v1477_v59 = vadd.f32 %v1777_v11, %v3082_v37 }
 0x29f   : > { %1542 = vst [vmem:[%s3089_s23 + $0xf0] sm:$0xff] %v1510_v30  ;;  %v1511_v15 = vadd.f32 %v2019_v0, %v1477_v59 }
 0x2a1   : > { %1543 = vst [vmem:[%s3089_s23 + $0xf8] sm:$0xff] %v1511_v15 }
 0x2a2   : > { %2033 = shalt.err (!%p2030_p3)
}
 0x2a3   : > { %s2034_s8 = scalar_lea.hbm %s3186_s25, 4096  ;;  %s2038_s15 = scalar_lea.hbm %s3241_s5, 8192 }
 0x2a4   : > { %p2035_p4 = scmp.ne.s32.totalorder %s3186_s25, %s2034_s8  ;;  %p2039_p9 = scmp.lt.u32.totalorder %s3186_s25, %s3241_s5 }
 0x2a5   : > { %p2040_p10 = scmp.lt.u32.totalorder %s2038_s15, %s2034_s8  ;;  %p2042_p12 = scmp.lt.u32.totalorder %s2034_s8, %s3186_s25 }
 0x2a6   : > { %p2036_p7 = pnand %p2035_p4, %p2156_p5 }
 0x2a7   : > { %p2041_p11 = por %p2040_p10, %p2039_p9 }
 0x2a8   : > { %p2037_p8 = pneg %p2036_p7 }
 0x2a9   : > { %p2043_p13 = por %p2042_p12, %p2041_p11 }
 0x2ab   : > { %p2044_p0 = pnand %p2043_p13, %p2037_p8 }
 0x2ad   : > { %2047 = shalt.err (!%p2044_p0)
}
 0x2ae   : > { %s2086_s23 = smov 128   ;;  %s2087_s26 = smov 8  }
 0x2af   : > { %1778 = dma.vmem_to_hbm [thread:$0]  (%p2156_p5), %s3188_s30, 4096, %s3186_s25, %s3195_s22, %s2086_s23, %s2086_s23, %s2087_s26  }
 0x2b0 PF: > { %p1784_p1 = scmp.ge.s32.totalorder %s2082_s21, 2  ;;  %s1573_s6 = sand.u32 1, %s2070_s18  }
 0x2b1   : > { %s1574_s7 = scalar_lea.sflag [#allocation3], %s1573_s6 }
 0x2b2   : > { %p1781_p2 = pnand %p1784_p1, %p2160_p6 }
 0x2b4   : > { %2065 = dma.done.wait (!%p1781_p2), %s1574_s7, 4096  }
 0x2b5   : > { %2067 = vsyncadd (!%p1781_p2), %s1574_s7, 4294963200  ;;  %p15_p3 = scmp.ge.s32.totalorder %s2143_s24, 4   ;;  %s3244_s18 = smov %s2074_s19 }
 0x2b6   : > { %s3245_s19 = smov %s2078_s20  ;;  %s3246_s20 = smov %s2154_s27 }
 0x2b7   : > { %s3247_s21 = smov %s2143_s24  ;;  %17 = sbr.rel (!%p15_p3) target bundleno = 3 (0x3), region = 75 }
 0x2be   :  { %1579 = vsyncpa [#allocation3], 1 }
 0x2bf   :  { %1581 = vsyncpa [#allocation3 + $0x1], 1 }

</bundles_post_ra>
